<compile_context>
chip_gen: v5e
topology: v5e:2x2
jax: 0.10.0
libtpu: 0.0.40
codegen_flags: <defaults>
</compile_context>

<pallas_src>
import functools
import math

import jax
import jax.numpy as jnp
from jax.experimental import pallas as pl
from jax.experimental.pallas import tpu as pltpu


def _round_up(x: int, mult: int) -> int:
    return ((x + mult - 1) // mult) * mult


def _detect_is_v7x() -> bool:
    """Best-effort chip detection (v7x: 2 TensorCores, 64 MiB VMEM/TC)."""
    try:
        return "v7" in jax.devices()[0].device_kind.lower()
    except Exception:  # pragma: no cover - detection is advisory only
        return False


def _pick_tiles(m: int, ve_dim: int, lm_dim: int, is_v7x: bool):
    """Generation-aware (tm, tn) selection."""
    # --- N tile: keep the W block VMEM-friendly -------------------------
    # v7x: 64 MiB physical VMEM -> cap tn at 1024 so even large ve_dim fits.
    # v6e/v5e: 128 MiB VMEM -> wider tiles (bigger DMAs, fewer grid steps).
    tn_cap = 1024 if is_v7x else 2048
    tn = lm_dim if lm_dim <= tn_cap else tn_cap

    # --- M tile ----------------------------------------------------------
    tm_cap = 512 if is_v7x else 1024
    if m <= 8:
        tm = m                                   # block == full array extent
    elif m <= tm_cap:
        tm = _round_up(m, 8)                     # one tile covers everything
    else:
        # Balanced tiles (rounded to the sublane multiple of 8, not 256) so
        # the two v7x TensorCores get near-equal work.
        m_tiles = pl.cdiv(m, tm_cap)
        tm = _round_up(pl.cdiv(m, m_tiles), 8)

    # v7x small-M: if the grid would be (1, 1), split N so both TensorCores
    # get a disjoint half of W (no duplicated W HBM traffic, half the
    # per-core VMEM).  Harmless no-op on single-core chips (not triggered).
    if (is_v7x and pl.cdiv(m, tm) == 1 and pl.cdiv(lm_dim, tn) == 1
            and lm_dim >= 256 and lm_dim % 256 == 0):
        tn = lm_dim // 2
    return tm, tn


def _maybe_single_buffered(block_shape, index_map, enable: bool):
    """Single-buffered BlockSpec for blocks whose index is constant along the
    fast grid axis (double-buffering them only wastes VMEM)."""
    if enable and hasattr(pl, "Buffered"):
        try:
            return pl.BlockSpec(block_shape, index_map,
                                pipeline_mode=pl.Buffered(1))
        except Exception:
            pass
    return pl.BlockSpec(block_shape, index_map)


def _linear_kernel(x_ref, w_ref, b_ref, o_ref, *, compute_dtype):
    # x_ref: (tm, ve_dim)  w_ref: (ve_dim, tn)  b_ref: (1, tn)  o_ref: (tm, tn)
    compute_dtype = jnp.dtype(compute_dtype)
    x = x_ref[...]
    w = w_ref[...]
    if x.dtype != compute_dtype:
        x = x.astype(compute_dtype)
    if w.dtype != compute_dtype:
        w = w.astype(compute_dtype)
    acc = jnp.dot(x, w, preferred_element_type=jnp.float32)
    # Epilogue (bias add + final cast) stays in f32: correct on v5e (no bf16
    # VPU) and free elsewhere (VPU slack in a mem-bound kernel).
    o_ref[...] = (acc + b_ref[...].astype(jnp.float32)).astype(o_ref.dtype)


def init_vision_proj_params(key, ve_dim=768, lm_dim=512, dtype=jnp.float32):
    """Synthetic init matching torch nn.Linear(ve_dim, lm_dim): W (lm_dim, ve_dim), b (lm_dim,)."""
    kw, kb = jax.random.split(key)
    bound = 1.0 / (ve_dim ** 0.5)   # torch default: U(-1/sqrt(in), 1/sqrt(in))
    weight = jax.random.uniform(kw, (lm_dim, ve_dim), dtype, -bound, bound)
    bias = jax.random.uniform(kb, (lm_dim,), dtype, -bound, bound)
    return weight, bias


def prepare_vision_proj_params(weight, bias, param_dtype=jnp.bfloat16):
    """One-time (outside jit) prep: transpose W to (ve_dim, lm_dim) and cast.

    Doing this once avoids a full HBM round-trip of W (weight.T) on every
    forward call; bf16 weights halve per-call weight HBM traffic and use the
    MXU's native bf16 datapath.  Bias stays f32 (epilogue runs in f32).
    """
    w_t = jnp.asarray(weight.T, dtype=param_dtype)              # (ve_dim, lm_dim)
    b2 = jnp.asarray(bias, dtype=jnp.float32).reshape(1, -1)    # (1, lm_dim)
    return w_t, b2


@functools.partial(jax.jit,
                   static_argnames=("tm", "tn", "compute_dtype", "out_dtype"))
def vision_proj_forward(image_encoders, w_t, bias2d, *, tm=None, tn=None,
                        compute_dtype=jnp.bfloat16, out_dtype=jnp.bfloat16):
    """image_encoders: (..., ve_dim); w_t: (ve_dim, lm_dim); bias2d: (1, lm_dim).

    out_dtype=None inherits the input dtype (precision-sensitive consumers);
    the default bf16 halves output HBM traffic in this mem-bound kernel.
    """
    ve_dim, lm_dim = w_t.shape
    orig_shape = image_encoders.shape
    x = image_encoders.reshape(-1, ve_dim)
    m = x.shape[0]

    is_v7x = _detect_is_v7x()
    auto_tm, auto_tn = _pick_tiles(m, ve_dim, lm_dim, is_v7x)
    tm = auto_tm if tm is None else tm
    tn = auto_tn if tn is None else tn
    m_tiles = pl.cdiv(m, tm)
    n_tiles = pl.cdiv(lm_dim, tn)

    out_dtype = x.dtype if out_dtype is None else jnp.dtype(out_dtype)

    # Grid order: N outer ("slow"), M inner ("fast") so the W / bias block
    # index never changes between consecutive steps -> W is DMA'd only
    # n_tiles times total (once per disjoint N block).
    grid = (n_tiles, m_tiles)

    # Single-buffer W / bias once the W block is big enough for the VMEM
    # saving to matter (index constant along the fast axis).
    w_block_bytes = ve_dim * tn * jnp.dtype(w_t.dtype).itemsize
    single_buf = w_block_bytes >= (2 << 20)
    w_spec = _maybe_single_buffered((ve_dim, tn), lambda j, i: (0, j), single_buf)
    b_spec = _maybe_single_buffered((1, tn), lambda j, i: (0, j), single_buf)

    # HBM traffic: x re-read once per N tile; W/bias read once; output once.
    bytes_accessed = (
        n_tiles * x.size * x.dtype.itemsize
        + w_t.size * w_t.dtype.itemsize
        + bias2d.size * bias2d.dtype.itemsize
        + m * lm_dim * out_dtype.itemsize)
    cost = pl.CostEstimate(flops=2 * m * ve_dim * lm_dim,
                           transcendentals=0,
                           bytes_accessed=bytes_accessed)

    out = pl.pallas_call(
        functools.partial(_linear_kernel, compute_dtype=compute_dtype),
        out_shape=jax.ShapeDtypeStruct((m, lm_dim), out_dtype),
        grid_spec=pltpu.PrefetchScalarGridSpec(
            num_scalar_prefetch=0,
            grid=grid,
            in_specs=[
                pl.BlockSpec((tm, ve_dim), lambda j, i: (i, 0)),   # x tile
                w_spec,                                            # weight tile
                b_spec,                                            # bias tile
            ],
            out_specs=pl.BlockSpec((tm, tn), lambda j, i: (i, j)),
        ),
        compiler_params=pltpu.CompilerParams(
            dimension_semantics=("parallel", "parallel"),
            # v7x: 64 MiB physical VMEM -> 32 MiB scoped; v6e/v5e: 128 MiB
            # physical -> 64 MiB scoped allows the bigger tiles picked above.
            vmem_limit_bytes=(32 << 20) if is_v7x else (64 << 20),
        ),
        cost_estimate=cost,
    )(x, w_t, bias2d)

    return out.reshape(*orig_shape[:-1], lm_dim)


def vision_proj(image_encoders, w_t, bias2d, *, min_pallas_rows=64, **kwargs):
    """Dispatcher: at tiny M a standalone pallas_call is dominated by launch
    overhead, so fall through to a plain XLA dot that the surrounding graph
    can fuse; otherwise use the Pallas kernel."""
    m = math.prod(image_encoders.shape[:-1]) if image_encoders.ndim > 1 else 1
    if m < min_pallas_rows:
        out_dtype = kwargs.get("out_dtype", jnp.bfloat16)
        out_dtype = image_encoders.dtype if out_dtype is None else out_dtype
        acc = jnp.dot(image_encoders.astype(w_t.dtype), w_t,
                      preferred_element_type=jnp.float32)
        return (acc + bias2d[0]).astype(out_dtype)
    return vision_proj_forward(image_encoders, w_t, bias2d, **kwargs)


if __name__ == "__main__":
    ve_dim, lm_dim = 768, 512   # module defaults
    batch, seq = 2, 8

    key = jax.random.PRNGKey(0)
    k_x, k_p = jax.random.split(key)

    # Producer contract: the vision encoder emits bf16 activations, so the
    # kernel DMAs 2 B/elem of x.  (No wrapper-side cast: that would be an
    # extra HBM pass.)
    image_encoders = jax.random.normal(k_x, (batch, seq, ve_dim), jnp.bfloat16)
    weight, bias = init_vision_proj_params(k_p, ve_dim, lm_dim)

    # One-time param prep (outside the jitted forward).
    w_t, b2 = prepare_vision_proj_params(weight, bias)

    out = vision_proj_forward(image_encoders, w_t, b2)   # Pallas path
    out = jax.block_until_ready(out)

    # Cross-check against plain-JAX reference of nn.Linear semantics.
    # bf16 operands + bf16 output (f32 accumulate) drift slightly from the
    # pure-f32 reference, hence the loosened tolerance.
    ref = image_encoders.astype(jnp.float32) @ weight.T + bias
    assert out.shape == (batch, seq, lm_dim)
    assert out.dtype == jnp.bfloat16
    err = float(jnp.max(jnp.abs(out.astype(jnp.float32) - ref)))
    assert jnp.allclose(out.astype(jnp.float32), ref, atol=5e-2, rtol=5e-2), (
        "max abs err = %f" % err)

    print("KERNEL_OK")
</pallas_src>

<mosaic_0001>
module attributes {stable_mosaic.version = 11 : i64} {
  func.func @_linear_kernel(%arg0: i32, %arg1: i32, %arg2: memref<16x768xbf16, #tpu.memory_space<vmem>>, %arg3: memref<768x512xbf16, #tpu.memory_space<vmem>>, %arg4: memref<1x512xf32, #tpu.memory_space<vmem>>, %arg5: memref<16x512xbf16, #tpu.memory_space<vmem>>) attributes {dimension_semantics = [#tpu.dimension_semantics<parallel>, #tpu.dimension_semantics<parallel>], iteration_bounds = array<i64: 1, 1>, scalar_prefetch = 0 : i64, scratch_operands = 0 : i64, tpu.core_type = #tpu.core_type<tc>, window_params = [{transform_indices = @transform_0, window_bounds = array<i64: 16, 768>}, {transform_indices = @transform_1, window_bounds = array<i64: 768, 512>}, {transform_indices = @transform_2, window_bounds = array<i64: 1, 512>}, {transform_indices = @transform_3, window_bounds = array<i64: 16, 512>}]} {
    %c0 = arith.constant 0 : index
    %c0_0 = arith.constant 0 : index
    %0 = vector.load %arg2[%c0, %c0_0] : memref<16x768xbf16, #tpu.memory_space<vmem>>, vector<16x768xbf16>
    %c0_1 = arith.constant 0 : index
    %c0_2 = arith.constant 0 : index
    %1 = vector.load %arg3[%c0_1, %c0_2] : memref<768x512xbf16, #tpu.memory_space<vmem>>, vector<768x512xbf16>
    %cst = arith.constant dense<0.000000e+00> : vector<16x512xf32>
    %2 = tpu.matmul %0, %1, %cst {dimension_numbers = #tpu.dot_dimension_numbers<[1], [0], [0], [1], [0, 0, 1, 1], [], []>} : vector<16x768xbf16>, vector<768x512xbf16>, vector<16x512xf32> -> vector<16x512xf32>
    %c0_3 = arith.constant 0 : index
    %c0_4 = arith.constant 0 : index
    %3 = vector.load %arg4[%c0_3, %c0_4] : memref<1x512xf32, #tpu.memory_space<vmem>>, vector<1x512xf32>
    %4 = vector.broadcast %3 : vector<1x512xf32> to vector<16x512xf32>
    %5 = arith.addf %2, %4 : vector<16x512xf32>
    %6 = arith.truncf %5 : vector<16x512xf32> to vector<16x512xbf16>
    %c0_5 = arith.constant 0 : index
    %c0_6 = arith.constant 0 : index
    %7 = vector.load %arg5[%c0_5, %c0_6] : memref<16x512xbf16, #tpu.memory_space<vmem>>, vector<16x512xbf16>
    tpu.vector_store %arg5[%c0_5, %c0_6], %6 {strides = array<i32>} : memref<16x512xbf16, #tpu.memory_space<vmem>>, vector<16x512xbf16>,
    return
  }
  func.func @transform_0(%arg0: i32, %arg1: i32) -> (i32, i32) {
    %c0_i32 = arith.constant 0 : i32
    %c0_i32_0 = arith.constant 0 : i32
    return %arg1, %c0_i32 : i32, i32
  }
  func.func @transform_1(%arg0: i32, %arg1: i32) -> (i32, i32) {
    %c0_i32 = arith.constant 0 : i32
    %c0_i32_0 = arith.constant 0 : i32
    return %c0_i32, %arg0 : i32, i32
  }
  func.func @transform_2(%arg0: i32, %arg1: i32) -> (i32, i32) {
    %c0_i32 = arith.constant 0 : i32
    %c0_i32_0 = arith.constant 0 : i32
    return %c0_i32, %arg0 : i32, i32
  }
  func.func @transform_3(%arg0: i32, %arg1: i32) -> (i32, i32) {
    %c0_i32 = arith.constant 0 : i32
    return %arg1, %arg0 : i32, i32
  }
}

</mosaic_0001>

<bundles_post_ra>
// kernel: vision_proj_forward.1
= control target key start
LH: loop header
LB: loop body
LE: loop exit
PB: predicated region body
PF: predicated region fallthrough
CT: control target
= control target key end

     0   :  { %8 = vsyncpa [#allocation3], 0  ;;  %s2810_s0 = inlined_call_operand.hbm [shape: bf16[16,768], index: 0, kind: input, shape index: {}]   ;;  %s2811_s1 = inlined_call_operand.hbm [shape: bf16[768,512], index: 1, kind: input, shape index: {}]   ;;  %s2812_s2 = inlined_call_operand.hbm [shape: f32[1,512], index: 2, kind: input, shape index: {}]   ;;  %s2813_s3 = inlined_call_operand.hbm [shape: bf16[16,512], index: 3, kind: output, shape index: {}]  }
   0x1   :  { %9 = vsyncpa [#allocation6], 0  ;;  %s28_s14 = sshll.u32 %s2811_s1, 4  ;;  %s29_s14 = int_to_ptr.hbm [resolvable:$true] %s28_s14 }
   0x2   :  { %10 = vsyncpa [#allocation4], 0  ;;  %s2722_s15 = smov [#allocation5]   ;;  %s15_s19 = sshll.u32 %s2810_s0, 4  ;;  %s16_s19 = int_to_ptr.hbm [resolvable:$true] %s15_s19 }
   0x3   :  { %s30_s16 = sshll.u32 %s2722_s15, 4  ;;  %s2723_s20 = smov 256   ;;  %s31_s16 = int_to_ptr.vmem [resolvable:$true] %s30_s16 }
   0x4   :  { %s2724_s21 = smov 16   ;;  %s2725_s22 = smov [#allocation2]  }
   0x5   :  { %36 = dma.hbm_to_vmem [thread:$0]  %s29_s14, 24576, %s31_s16, [#allocation6], %s2723_s20, %s2723_s20, %s2724_s21  }
   0x6   :  { %s17_s23 = sshll.u32 %s2725_s22, 4  ;;  %s2726_s1 = smov 384   ;;  %s18_s23 = int_to_ptr.vmem [resolvable:$true] %s17_s23 }
   0x7   :  { %s2727_s24 = smov 24   ;;  %s42_s27 = sshll.u32 %s2812_s2, 4  ;;  %s43_s27 = int_to_ptr.hbm [resolvable:$true] %s42_s27 }
   0x8   :  { %23 = dma.hbm_to_vmem [thread:$0]  %s16_s19, 768, %s18_s23, [#allocation3], %s2726_s1, %s2726_s1, %s2727_s24  }
   0x9   :  { %s2728_s28 = smov [#allocation7]  }
   0xa   :  { %s44_s0 = sshll.u32 %s2728_s28, 4  ;;  %s45_s0 = int_to_ptr.vmem [resolvable:$true] %s44_s0 }
   0xb   :  { %47 = dma.hbm_to_vmem [thread:$0]  %s43_s27, 64, %s45_s0, [#allocation6]  }
   0xc   :  { %2716 = dma.done.wait [#allocation3], 768  }
   0xd   :  { %2717 = vsyncadd [#allocation3], 4294966528 }
   0xe   :  { %2718 = dma.done.wait [#allocation6], 24640  }
   0xf   :  { %2719 = vsyncadd [#allocation6], 4294942656  ;;  %v1760_v0 = vld [vmem:[#allocation5 + $0xe0] sm:$0xf]  ;;  %v2450_v1 = vld [vmem:[#allocation5 + $0xec] sm:$0xf0] }
  0x10   :  { %v1888_v2 = vld [vmem:[#allocation5 + $0x1e0] sm:$0xf]  ;;  %v1761_v3 = vor.u32 %v2450_v1, %v1760_v0  ;;  %v2482_v4 = vld [vmem:[#allocation5 + $0x1ec] sm:$0xf0]  ;;  %s2729_s2 = smov [#allocation8]   ;;  %s1608_s5 = sshll.u32 %s2813_s3, 4  ;;  %s1609_s5 = int_to_ptr.hbm [resolvable:$true] %s1608_s5 }
  0x11   :  { %v2016_v5 = vld [vmem:[#allocation5 + $0x2e0] sm:$0xf]  ;;  %v2514_v6 = vld [vmem:[#allocation5 + $0x2ec] sm:$0xf0]  ;;  %v1889_v7 = vor.u32 %v2482_v4, %v1888_v2  ;;  %s1606_s29 = sshll.u32 %s2729_s2, 4  ;;  %s1607_s29 = int_to_ptr.vmem [resolvable:$true] %s1606_s29 }
  0x12   :  { %v2017_v8 = vor.u32 %v2514_v6, %v2016_v5  ;;  %v2144_v9 = vld [vmem:[#allocation5 + $0x3e0] sm:$0xf]  ;;  %v2546_v10 = vld [vmem:[#allocation5 + $0x3ec] sm:$0xf0]  ;;  %1258 = vmatpush.bf16.msra.mxu0 %v1761_v3 }
  0x13   :  { %v1744_v11 = vld [vmem:[#allocation5 + $0xc0] sm:$0xf]  ;;  %v2145_v12 = vor.u32 %v2546_v10, %v2144_v9  ;;  %v2446_v13 = vld [vmem:[#allocation5 + $0xcc] sm:$0xf0]  ;;  %1272 = vmatpush.bf16.msra.mxu1 %v1889_v7 }
  0x14   :  { %v1872_v14 = vld [vmem:[#allocation5 + $0x1c0] sm:$0xf]  ;;  %v2478_v15 = vld [vmem:[#allocation5 + $0x1cc] sm:$0xf0]  ;;  %1286 = vmatpush.bf16.msra.mxu2 %v2017_v8  ;;  %v1745_v16 = vor.u32 %v2446_v13, %v1744_v11 }
  0x15   :  { %v1873_v17 = vor.u32 %v2478_v15, %v1872_v14  ;;  %v2000_v18 = vld [vmem:[#allocation5 + $0x2c0] sm:$0xf]  ;;  %v2510_v19 = vld [vmem:[#allocation5 + $0x2cc] sm:$0xf0]  ;;  %1300 = vmatpush.bf16.msra.mxu3 %v2145_v12 }
  0x16   :  { %v2128_v20 = vld [vmem:[#allocation5 + $0x3c0] sm:$0xf]  ;;  %v2001_v21 = vor.u32 %v2510_v19, %v2000_v18  ;;  %v2542_v22 = vld [vmem:[#allocation5 + $0x3cc] sm:$0xf0]  ;;  %1259 = vmatpush.bf16.msra.mxu0 %v1745_v16 }
  0x17   :  { %v1728_v23 = vld [vmem:[#allocation5 + $0xa0] sm:$0xf]  ;;  %v2442_v24 = vld [vmem:[#allocation5 + $0xac] sm:$0xf0]  ;;  %v2129_v25 = vor.u32 %v2542_v22, %v2128_v20  ;;  %1273 = vmatpush.bf16.msra.mxu1 %v1873_v17 }
  0x18   :  { %v1856_v26 = vld [vmem:[#allocation5 + $0x1a0] sm:$0xf]  ;;  %v2474_v27 = vld [vmem:[#allocation5 + $0x1ac] sm:$0xf0]  ;;  %v1729_v29 = vor.u32 %v2442_v24, %v1728_v23  ;;  %1287 = vmatpush.bf16.msra.mxu2 %v2001_v21 }
  0x19   :  { %v1984_v28 = vld [vmem:[#allocation5 + $0x2a0] sm:$0xf]  ;;  %v2506_v30 = vld [vmem:[#allocation5 + $0x2ac] sm:$0xf0]  ;;  %v1857_v33 = vor.u32 %v2474_v27, %v1856_v26  ;;  %1301 = vmatpush.bf16.msra.mxu3 %v2129_v25 }
  0x1a   :  { %v2112_v31 = vld [vmem:[#allocation5 + $0x3a0] sm:$0xf]  ;;  %v2538_v32 = vld [vmem:[#allocation5 + $0x3ac] sm:$0xf0]  ;;  %v1985_v34 = vor.u32 %v2506_v30, %v1984_v28  ;;  %1260 = vmatpush.bf16.msra.mxu0 %v1729_v29 }
  0x1b   :  { %v1712_v35 = vld [vmem:[#allocation5 + $0x80] sm:$0xf]  ;;  %v2438_v36 = vld [vmem:[#allocation5 + $0x8c] sm:$0xf0]  ;;  %v2113_v38 = vor.u32 %v2538_v32, %v2112_v31  ;;  %1274 = vmatpush.bf16.msra.mxu1 %v1857_v33  ;;  %v2448_v33 = vld [vmem:[#allocation5 + $0xe4] sm:$0xf] }
  0x1c   :  { %v1840_v37 = vld [vmem:[#allocation5 + $0x180] sm:$0xf]  ;;  %v2470_v39 = vld [vmem:[#allocation5 + $0x18c] sm:$0xf0]  ;;  %v1713_v44 = vor.u32 %v2438_v36, %v1712_v35  ;;  %1288 = vmatpush.bf16.msra.mxu2 %v1985_v34  ;;  %v1762_v34 = vld [vmem:[#allocation5 + $0xf0] sm:$0xf0] }
  0x1d   :  { %v1968_v40 = vld [vmem:[#allocation5 + $0x280] sm:$0xf]  ;;  %v2502_v41 = vld [vmem:[#allocation5 + $0x28c] sm:$0xf0]  ;;  %v1841_v45 = vor.u32 %v2470_v39, %v1840_v37  ;;  %1302 = vmatpush.bf16.msra.mxu3 %v2113_v38  ;;  %v2480_v37 = vld [vmem:[#allocation5 + $0x1e4] sm:$0xf] }
  0x1e   :  { %v2096_v42 = vld [vmem:[#allocation5 + $0x380] sm:$0xf]  ;;  %v2534_v43 = vld [vmem:[#allocation5 + $0x38c] sm:$0xf0]  ;;  %v1969_v46 = vor.u32 %v2502_v41, %v1968_v40  ;;  %1261 = vmatpush.bf16.msra.mxu0 %v1713_v44  ;;  %v1890_v38 = vld [vmem:[#allocation5 + $0x1f0] sm:$0xf0] }
  0x1f   :  { %v1696_v47 = vld [vmem:[#allocation5 + $0x60] sm:$0xf]  ;;  %v2434_v48 = vld [vmem:[#allocation5 + $0x6c] sm:$0xf0]  ;;  %v2097_v50 = vor.u32 %v2534_v43, %v2096_v42  ;;  %1275 = vmatpush.bf16.msra.mxu1 %v1841_v45  ;;  %v1765_v43 = vor.u32 %v2448_v33, %v1762_v34  ;;  %v1698_v33 = vld [vmem:[#allocation5 + $0x70] sm:$0xf0] }
  0x20   :  { %v1824_v49 = vld [vmem:[#allocation5 + $0x160] sm:$0xf]  ;;  %v2466_v51 = vld [vmem:[#allocation5 + $0x16c] sm:$0xf0]  ;;  %v1697_v56 = vor.u32 %v2434_v48, %v1696_v47  ;;  %1289 = vmatpush.bf16.msra.mxu2 %v1969_v46  ;;  %v1893_v47 = vor.u32 %v2480_v37, %v1890_v38  ;;  %v2444_v48 = vld [vmem:[#allocation5 + $0xc4] sm:$0xf] }
  0x21   :  { %v1952_v52 = vld [vmem:[#allocation5 + $0x260] sm:$0xf]  ;;  %v2498_v53 = vld [vmem:[#allocation5 + $0x26c] sm:$0xf0]  ;;  %v1825_v57 = vor.u32 %v2466_v51, %v1824_v49  ;;  %1303 = vmatpush.bf16.msra.mxu3 %v2097_v50  ;;  %v1746_v49 = vld [vmem:[#allocation5 + $0xd0] sm:$0xf0] }
  0x22   :  { %v2080_v54 = vld [vmem:[#allocation5 + $0x360] sm:$0xf]  ;;  %v2530_v55 = vld [vmem:[#allocation5 + $0x36c] sm:$0xf0]  ;;  %v1953_v58 = vor.u32 %v2498_v53, %v1952_v52  ;;  %1262 = vmatpush.bf16.msra.mxu0 %v1697_v56  ;;  %v2476_v50 = vld [vmem:[#allocation5 + $0x1c4] sm:$0xf] }
  0x23   :  { %v1680_v59 = vld [vmem:[#allocation5 + $0x40] sm:$0xf]  ;;  %v2430_v60 = vld [vmem:[#allocation5 + $0x4c] sm:$0xf0]  ;;  %v2081_v62 = vor.u32 %v2530_v55, %v2080_v54  ;;  %1276 = vmatpush.bf16.msra.mxu1 %v1825_v57  ;;  %v1874_v51 = vld [vmem:[#allocation5 + $0x1d0] sm:$0xf0] }
  0x24   :  { %v1808_v61 = vld [vmem:[#allocation5 + $0x140] sm:$0xf]  ;;  %v2462_v63 = vld [vmem:[#allocation5 + $0x14c] sm:$0xf0]  ;;  %v1681_v4 = vor.u32 %v2430_v60, %v1680_v59  ;;  %1290 = vmatpush.bf16.msra.mxu2 %v1953_v58  ;;  %v2417_v53 = vld [vmem:[#allocation2 + $0x14] sm:$0xf0]  ;;  %v1749_v59 = vor.u32 %v2444_v48, %v1746_v49 }
  0x25   :  { %v1936_v0 = vld [vmem:[#allocation5 + $0x240] sm:$0xf]  ;;  %v2494_v1 = vld [vmem:[#allocation5 + $0x24c] sm:$0xf0]  ;;  %v1809_v5 = vor.u32 %v2462_v63, %v1808_v61  ;;  %1304 = vmatpush.bf16.msra.mxu3 %v2081_v62  ;;  %v2440_v62 = vld [vmem:[#allocation5 + $0xa4] sm:$0xf]  ;;  %v1877_v63 = vor.u32 %v2476_v50, %v1874_v51 }
  0x26   :  { %v2064_v2 = vld [vmem:[#allocation5 + $0x340] sm:$0xf]  ;;  %v2526_v3 = vld [vmem:[#allocation5 + $0x34c] sm:$0xf0]  ;;  %v1937_v6 = vor.u32 %v2494_v1, %v1936_v0  ;;  %1263 = vmatpush.bf16.msra.mxu0 %v1681_v4  ;;  %v1730_v0 = vld [vmem:[#allocation5 + $0xb0] sm:$0xf0] }
  0x27   :  { %v1664_v7 = vld [vmem:[#allocation5 + $0x20] sm:$0xf]  ;;  %v2426_v8 = vld [vmem:[#allocation5 + $0x2c] sm:$0xf0]  ;;  %v2065_v10 = vor.u32 %v2526_v3, %v2064_v2  ;;  %1277 = vmatpush.bf16.msra.mxu1 %v1809_v5  ;;  %v2414_v1 = vld [vmem:[#allocation2 + $0x4] sm:$0xf] }
  0x28   :  { %v1792_v9 = vld [vmem:[#allocation5 + $0x120] sm:$0xf]  ;;  %v2458_v11 = vld [vmem:[#allocation5 + $0x12c] sm:$0xf0]  ;;  %v1665_v16 = vor.u32 %v2426_v8, %v1664_v7  ;;  %1291 = vmatpush.bf16.msra.mxu2 %v1937_v6  ;;  %v1626_v2 = vld [vmem:[#allocation2 + $0x18] sm:$0xf0] }
  0x29   :  { %v1920_v12 = vld [vmem:[#allocation5 + $0x220] sm:$0xf]  ;;  %v2490_v13 = vld [vmem:[#allocation5 + $0x22c] sm:$0xf0]  ;;  %v1793_v19 = vor.u32 %v2458_v11, %v1792_v9  ;;  %1305 = vmatpush.bf16.msra.mxu3 %v2065_v10  ;;  %v2472_v3 = vld [vmem:[#allocation5 + $0x1a4] sm:$0xf]  ;;  %v2765_v6 = vor.u32 %v2414_v1, %v1626_v2 }
  0x2a   :  { %v2048_v14 = vld [vmem:[#allocation5 + $0x320] sm:$0xf]  ;;  %v2522_v15 = vld [vmem:[#allocation5 + $0x32c] sm:$0xf0]  ;;  %v1921_v20 = vor.u32 %v2490_v13, %v1920_v12  ;;  %1264 = vmatpush.bf16.msra.mxu0 %v1665_v16  ;;  %v1858_v4 = vld [vmem:[#allocation5 + $0x1b0] sm:$0xf0]  ;;  %v1733_v12 = vor.u32 %v2440_v62, %v1730_v0 }
  0x2b   :  { %v1648_v17 = vld [vmem:[#allocation5] sm:$0xf]  ;;  %v2422_v18 = vld [vmem:[#allocation5 + $0xc] sm:$0xf0]  ;;  %v2049_v24 = vor.u32 %v2522_v15, %v2048_v14  ;;  %1278 = vmatpush.bf16.msra.mxu1 %v1793_v19  ;;  %v2436_v13 = vld [vmem:[#allocation5 + $0x84] sm:$0xf]  ;;  %v1861_v16 = vor.u32 %v2472_v3, %v1858_v4 }
  0x2c   :  { %v1776_v21 = vld [vmem:[#allocation5 + $0x100] sm:$0xf]  ;;  %v2454_v22 = vld [vmem:[#allocation5 + $0x10c] sm:$0xf0]  ;;  %v1649_v31 = vor.u32 %v2422_v18, %v1648_v17  ;;  %1292 = vmatpush.bf16.msra.mxu2 %v1921_v20  ;;  %v1714_v14 = vld [vmem:[#allocation5 + $0x90] sm:$0xf0] }
  0x2d   :  { %v1904_v23 = vld [vmem:[#allocation5 + $0x200] sm:$0xf]  ;;  %v2486_v25 = vld [vmem:[#allocation5 + $0x20c] sm:$0xf0]  ;;  %v1777_v35 = vor.u32 %v2454_v22, %v1776_v21  ;;  %1306 = vmatpush.bf16.msra.mxu3 %v2049_v24  ;;  %v1632_v15 = vld [vmem:[#allocation2 + $0x8] sm:$0xf] }
  0x2e   :  { %v2032_v26 = vld [vmem:[#allocation5 + $0x300] sm:$0xf]  ;;  %v2518_v27 = vld [vmem:[#allocation5 + $0x30c] sm:$0xf0]  ;;  %v1905_v36 = vor.u32 %v2486_v25, %v1904_v23  ;;  %1265 = vmatpush.bf16.msra.mxu0 %v1649_v31  ;;  %v2415_v18 = vld [vmem:[#allocation2 + $0xc] sm:$0xf] }
  0x2f   :  { %v2272_v28 = vld [vmem:[#allocation5 + $0x4e0] sm:$0xf]  ;;  %v2578_v29 = vld [vmem:[#allocation5 + $0x4ec] sm:$0xf0]  ;;  %v2033_v39 = vor.u32 %v2518_v27, %v2032_v26  ;;  %1279 = vmatpush.bf16.msra.mxu1 %v1777_v35  ;;  %v1634_v19 = vld [vmem:[#allocation2 + $0x20] sm:$0xf0]  ;;  %v1717_v26 = vor.u32 %v2436_v13, %v1714_v14 }
  0x30   :  { %v2400_v30 = vld [vmem:[#allocation5 + $0x5e0] sm:$0xf]  ;;  %v2610_v32 = vld [vmem:[#allocation5 + $0x5ec] sm:$0xf0]  ;;  %v2273_v40 = vor.u32 %v2578_v29, %v2272_v28  ;;  %1293 = vmatpush.bf16.msra.mxu2 %v1905_v36  ;;  %v2468_v20 = vld [vmem:[#allocation5 + $0x184] sm:$0xf]  ;;  %v2770_v23 = vor.u32 %v2415_v18, %v1634_v19 }
  0x31   :  { %v2256_v41 = vld [vmem:[#allocation5 + $0x4c0] sm:$0xf]  ;;  %v2401_v42 = vor.u32 %v2610_v32, %v2400_v30  ;;  %v2574_v44 = vld [vmem:[#allocation5 + $0x4cc] sm:$0xf0]  ;;  %1307 = vmatpush.bf16.msra.mxu3 %v2033_v39  ;;  %v1842_v21 = vld [vmem:[#allocation5 + $0x190] sm:$0xf0] }
  0x32   :  { %v2384_v45 = vld [vmem:[#allocation5 + $0x5c0] sm:$0xf]  ;;  %v2606_v46 = vld [vmem:[#allocation5 + $0x5cc] sm:$0xf0]  ;;  %1314 = vmatpush.bf16.msrb.mxu0 %v2273_v40  ;;  %v2257_v54 = vor.u32 %v2574_v44, %v2256_v41  ;;  %1280 = vmatmul.bf16.vlgmr.msra.gmra.mxu1 %v2765_v6  ;;  %v1845_v30 = vor.u32 %v2468_v20, %v1842_v21  ;;  %v2432_v32 = vld [vmem:[#allocation5 + $0x64] sm:$0xf] }
  0x33   :  { %v1624_v52 = vld [vmem:[#allocation2] sm:$0xf]  ;;  %v2240_v55 = vld [vmem:[#allocation5 + $0x4a0] sm:$0xf]  ;;  %1328 = vmatpush.bf16.msrb.mxu1 %v2401_v42  ;;  %v2385_v58 = vor.u32 %v2606_v46, %v2384_v45  ;;  %v2464_v34 = vld [vmem:[#allocation5 + $0x164] sm:$0xf]  ;;  %v1701_v38 = vor.u32 %v2432_v32, %v1698_v33 }
  0x34   :  { %v2570_v56 = vld [vmem:[#allocation5 + $0x4ac] sm:$0xf0]  ;;  %v2762_v57 = vor.u32 %v2417_v53, %v1624_v52  ;;  %1342 = vmatpush.bf16.msrb.mxu2 %v1765_v43  ;;  %v2368_v60 = vld [vmem:[#allocation5 + $0x5a0] sm:$0xf]  ;;  %v1826_v35 = vld [vmem:[#allocation5 + $0x170] sm:$0xf0]  ;;  %1308 = vmatmul.bf16.vlgmr.msra.gmra.mxu3 %v2770_v23 }
  0x35   :  { %v2602_v61 = vld [vmem:[#allocation5 + $0x5ac] sm:$0xf0]  ;;  %1356 = vmatpush.bf16.msrb.mxu3 %v1893_v47  ;;  %v2224_v5 = vld [vmem:[#allocation5 + $0x480] sm:$0xf]  ;;  %v2241_v7 = vor.u32 %v2570_v56, %v2240_v55  ;;  %v1829_v42 = vor.u32 %v2464_v34, %v1826_v35  ;;  %v2428_v44 = vld [vmem:[#allocation5 + $0x44] sm:$0xf] }
  0x36   :  { %1266 = vmatmul.bf16.vlgmr.msra.gmra.mxu0 %v2762_v57  ;;  %v2566_v8 = vld [vmem:[#allocation5 + $0x48c] sm:$0xf0]  ;;  %v2352_v9 = vld [vmem:[#allocation5 + $0x580] sm:$0xf]  ;;  %v2369_v11 = vor.u32 %v2602_v61, %v2368_v60  ;;  %v1682_v45 = vld [vmem:[#allocation5 + $0x50] sm:$0xf0] }
  0x37   :  { %1315 = vmatpush.bf16.msrb.mxu0 %v2257_v54  ;;  %v2598_v10 = vld [vmem:[#allocation5 + $0x58c] sm:$0xf0]  ;;  %1329 = vmatpush.bf16.msrb.mxu1 %v2385_v58  ;;  %v2225_v24 = vor.u32 %v2566_v8, %v2224_v5  ;;  %v2208_v27 = vld [vmem:[#allocation5 + $0x460] sm:$0xf]  ;;  %v2460_v46 = vld [vmem:[#allocation5 + $0x144] sm:$0xf]  ;;  %v1685_v50 = vor.u32 %v2428_v44, %v1682_v45 }
  0x38   :  { %1343 = vmatpush.bf16.msrb.mxu2 %v1749_v59  ;;  %v2418_v17 = vld [vmem:[#allocation2 + $0x1c] sm:$0xf0]  ;;  %v2353_v25 = vor.u32 %v2598_v10, %v2352_v9  ;;  %v2336_v29 = vld [vmem:[#allocation5 + $0x560] sm:$0xf]  ;;  %v1810_v47 = vld [vmem:[#allocation5 + $0x150] sm:$0xf0] }
  0x39   :  { %1357 = vmatpush.bf16.msrb.mxu3 %v1877_v63  ;;  %v2768_v22 = vor.u32 %v2418_v17, %v1632_v15  ;;  %v2562_v28 = vld [vmem:[#allocation5 + $0x46c] sm:$0xf0]  ;;  %v2192_v39 = vld [vmem:[#allocation5 + $0x440] sm:$0xf]  ;;  %v1813_v54 = vor.u32 %v2460_v46, %v1810_v47  ;;  %v2424_v56 = vld [vmem:[#allocation5 + $0x24] sm:$0xf] }
  0x3a   :  { %v2594_v31 = vld [vmem:[#allocation5 + $0x56c] sm:$0xf0]  ;;  %v2209_v36 = vor.u32 %v2562_v28, %v2208_v27  ;;  %v2320_v41 = vld [vmem:[#allocation5 + $0x540] sm:$0xf]  ;;  %v1666_v58 = vld [vmem:[#allocation5 + $0x30] sm:$0xf0] }
  0x3b   :  { %1316 = vmatpush.bf16.msrb.mxu0 %v2241_v7  ;;  %1330 = vmatpush.bf16.msrb.mxu1 %v2369_v11  ;;  %v2337_v37 = vor.u32 %v2594_v31, %v2336_v29  ;;  %v2558_v40 = vld [vmem:[#allocation5 + $0x44c] sm:$0xf0]  ;;  %v2176_v51 = vld [vmem:[#allocation5 + $0x420] sm:$0xf]  ;;  %v2456_v59 = vld [vmem:[#allocation5 + $0x124] sm:$0xf]  ;;  %v1669_v2 = vor.u32 %v2424_v56, %v1666_v58 }
  0x3c   :  { %1344 = vmatpush.bf16.msrb.mxu2 %v1733_v12  ;;  %v2590_v43 = vld [vmem:[#allocation5 + $0x54c] sm:$0xf0]  ;;  %v2193_v48 = vor.u32 %v2558_v40, %v2192_v39  ;;  %v2304_v53 = vld [vmem:[#allocation5 + $0x520] sm:$0xf]  ;;  %v1794_v60 = vld [vmem:[#allocation5 + $0x130] sm:$0xf0] }
  0x3d   :  { %1358 = vmatpush.bf16.msrb.mxu3 %v1861_v16  ;;  %1294 = vmatmul.bf16.vlgmr.msra.gmra.mxu2 %v2768_v22  ;;  %v2321_v49 = vor.u32 %v2590_v43, %v2320_v41  ;;  %v2554_v52 = vld [vmem:[#allocation5 + $0x42c] sm:$0xf0]  ;;  %v2160_v62 = vld [vmem:[#allocation5 + $0x400] sm:$0xf]  ;;  %v2420_v4 = vld [vmem:[#allocation5 + $0x4] sm:$0xf]  ;;  %v1797_v7 = vor.u32 %v2456_v59, %v1794_v60 }
  0x3e   :  { %v2586_v55 = vld [vmem:[#allocation5 + $0x52c] sm:$0xf0]  ;;  %v2177_v61 = vor.u32 %v2554_v52, %v2176_v51  ;;  %v2288_v0 = vld [vmem:[#allocation5 + $0x500] sm:$0xf]  ;;  %v1650_v5 = vld [vmem:[#allocation5 + $0x10] sm:$0xf0] }
  0x3f   :  { %1317 = vmatpush.bf16.msrb.mxu0 %v2225_v24  ;;  %1331 = vmatpush.bf16.msrb.mxu1 %v2353_v25  ;;  %v2550_v63 = vld [vmem:[#allocation5 + $0x40c] sm:$0xf0]  ;;  %v2305_v1 = vor.u32 %v2586_v55, %v2304_v53  ;;  %v2452_v8 = vld [vmem:[#allocation5 + $0x104] sm:$0xf]  ;;  %v1778_v9 = vld [vmem:[#allocation5 + $0x110] sm:$0xf0]  ;;  %v1653_v19 = vor.u32 %v2420_v4, %v1650_v5 }
  0x40   :  { %1345 = vmatpush.bf16.msrb.mxu2 %v1717_v26  ;;  %v2582_v3 = vld [vmem:[#allocation5 + $0x50c] sm:$0xf0]  ;;  %v2512_v10 = vld [vmem:[#allocation5 + $0x2e4] sm:$0xf]  ;;  %v2018_v11 = vld [vmem:[#allocation5 + $0x2f0] sm:$0xf0]  ;;  %v2161_v14 = vor.u32 %v2550_v63, %v2160_v62  ;;  %v1781_v25 = vor.u32 %v2452_v8, %v1778_v9 }
  0x41   :  { %1359 = vmatpush.bf16.msrb.mxu3 %v1845_v30  ;;  %v2544_v12 = vld [vmem:[#allocation5 + $0x3e4] sm:$0xf]  ;;  %v2146_v13 = vld [vmem:[#allocation5 + $0x3f0] sm:$0xf0]  ;;  %v2289_v18 = vor.u32 %v2582_v3, %v2288_v0  ;;  %v1640_v21 = vld [vmem:[#allocation2 + $0x10] sm:$0xf]  ;;  %v2021_v26 = vor.u32 %v2512_v10, %v2018_v11 }
  0x42   :  { %v2576_v15 = vld [vmem:[#allocation5 + $0x4e4] sm:$0xf]  ;;  %v2274_v16 = vld [vmem:[#allocation5 + $0x4f0] sm:$0xf0]  ;;  %v2419_v24 = vld [vmem:[#allocation2 + $0x24] sm:$0xf0]  ;;  %v2149_v29 = vor.u32 %v2544_v12, %v2146_v13 }
  0x43   :  { %1318 = vmatpush.bf16.msrb.mxu0 %v2209_v36  ;;  %1332 = vmatpush.bf16.msrb.mxu1 %v2337_v37  ;;  %v2608_v17 = vld [vmem:[#allocation5 + $0x5e4] sm:$0xf]  ;;  %v2402_v20 = vld [vmem:[#allocation5 + $0x5f0] sm:$0xf0]  ;;  %v1642_v28 = vld [vmem:[#allocation2 + $0x28] sm:$0xf0]  ;;  %v2277_v30 = vor.u32 %v2576_v15, %v2274_v16  ;;  %v2774_v35 = vor.u32 %v2419_v24, %v1640_v21 }
  0x44   :  { %1346 = vmatpush.bf16.msrb.mxu2 %v1701_v38  ;;  %v2416_v27 = vld [vmem:[#allocation2 + $0x14] sm:$0xf]  ;;  %v2002_v32 = vld [vmem:[#allocation5 + $0x2d0] sm:$0xf0]  ;;  %v2405_v34 = vor.u32 %v2608_v17, %v2402_v20 }
  0x45   :  { %1360 = vmatpush.bf16.msrb.mxu3 %v1829_v42  ;;  %v2508_v31 = vld [vmem:[#allocation5 + $0x2c4] sm:$0xf]  ;;  %v2130_v36 = vld [vmem:[#allocation5 + $0x3d0] sm:$0xf0]  ;;  %v2776_v39 = vor.u32 %v2416_v27, %v1642_v28 }
  0x46   :  { %v2540_v33 = vld [vmem:[#allocation5 + $0x3c4] sm:$0xf]  ;;  %v2258_v38 = vld [vmem:[#allocation5 + $0x4d0] sm:$0xf0]  ;;  %v2005_v42 = vor.u32 %v2508_v31, %v2002_v32 }
  0x47   :  { %1319 = vmatpush.bf16.msrb.mxu0 %v2193_v48  ;;  %1333 = vmatpush.bf16.msrb.mxu1 %v2321_v49  ;;  %v2572_v37 = vld [vmem:[#allocation5 + $0x4c4] sm:$0xf]  ;;  %v2386_v41 = vld [vmem:[#allocation5 + $0x5d0] sm:$0xf0]  ;;  %v2133_v43 = vor.u32 %v2540_v33, %v2130_v36 }
  0x48   :  { %1347 = vmatpush.bf16.msrb.mxu2 %v1685_v50  ;;  %v2604_v40 = vld [vmem:[#allocation5 + $0x5c4] sm:$0xf]  ;;  %v2261_v44 = vor.u32 %v2572_v37, %v2258_v38  ;;  %v1986_v46 = vld [vmem:[#allocation5 + $0x2b0] sm:$0xf0] }
  0x49   :  { %1361 = vmatpush.bf16.msrb.mxu3 %v1813_v54  ;;  %v2504_v45 = vld [vmem:[#allocation5 + $0x2a4] sm:$0xf]  ;;  %v2389_v48 = vor.u32 %v2604_v40, %v2386_v41  ;;  %v2114_v49 = vld [vmem:[#allocation5 + $0x3b0] sm:$0xf0] }
  0x4a   :  { %v2536_v47 = vld [vmem:[#allocation5 + $0x3a4] sm:$0xf]  ;;  %v2242_v51 = vld [vmem:[#allocation5 + $0x4b0] sm:$0xf0]  ;;  %v1989_v54 = vor.u32 %v2504_v45, %v1986_v46 }
  0x4b   :  { %1320 = vmatpush.bf16.msrb.mxu0 %v2177_v61  ;;  %1334 = vmatpush.bf16.msrb.mxu1 %v2305_v1  ;;  %v2568_v50 = vld [vmem:[#allocation5 + $0x4a4] sm:$0xf]  ;;  %v2370_v53 = vld [vmem:[#allocation5 + $0x5b0] sm:$0xf0]  ;;  %v2117_v55 = vor.u32 %v2536_v47, %v2114_v49 }
  0x4c   :  { %1348 = vmatpush.bf16.msrb.mxu2 %v1669_v2  ;;  %v2600_v52 = vld [vmem:[#allocation5 + $0x5a4] sm:$0xf]  ;;  %v2245_v56 = vor.u32 %v2568_v50, %v2242_v51  ;;  %v1970_v59 = vld [vmem:[#allocation5 + $0x290] sm:$0xf0] }
  0x4d   :  { %1362 = vmatpush.bf16.msrb.mxu3 %v1797_v7  ;;  %v2500_v58 = vld [vmem:[#allocation5 + $0x284] sm:$0xf]  ;;  %v2373_v61 = vor.u32 %v2600_v52, %v2370_v53  ;;  %v2098_v62 = vld [vmem:[#allocation5 + $0x390] sm:$0xf0] }
  0x4e   :  { %v2532_v60 = vld [vmem:[#allocation5 + $0x384] sm:$0xf]  ;;  %v2226_v0 = vld [vmem:[#allocation5 + $0x490] sm:$0xf0]  ;;  %v1973_v3 = vor.u32 %v2500_v58, %v1970_v59  ;;  %v2451_v58 = vld [vmem:[#allocation5 + $0xf4] sm:$0xf0] }
  0x4f   :  { %1321 = vmatpush.bf16.msrb.mxu0 %v2161_v14  ;;  %1335 = vmatpush.bf16.msrb.mxu1 %v2289_v18  ;;  %v2564_v63 = vld [vmem:[#allocation5 + $0x484] sm:$0xf]  ;;  %v2354_v2 = vld [vmem:[#allocation5 + $0x590] sm:$0xf0]  ;;  %v2101_v4 = vor.u32 %v2532_v60, %v2098_v62  ;;  %v1896_v59 = vld [vmem:[#allocation5 + $0x1e8] sm:$0xf] }
  0x50   :  { %1349 = vmatpush.bf16.msrb.mxu2 %v1653_v19  ;;  %v2596_v1 = vld [vmem:[#allocation5 + $0x584] sm:$0xf]  ;;  %v2229_v5 = vor.u32 %v2564_v63, %v2226_v0  ;;  %v1954_v8 = vld [vmem:[#allocation5 + $0x270] sm:$0xf0]  ;;  %v2024_v62 = vld [vmem:[#allocation5 + $0x2e8] sm:$0xf] }
  0x51   :  { %1363 = vmatpush.bf16.msrb.mxu3 %v1781_v25  ;;  %v2496_v7 = vld [vmem:[#allocation5 + $0x264] sm:$0xf]  ;;  %v2357_v10 = vor.u32 %v2596_v1, %v2354_v2  ;;  %v2082_v11 = vld [vmem:[#allocation5 + $0x370] sm:$0xf0]  ;;  %v2515_v63 = vld [vmem:[#allocation5 + $0x2f4] sm:$0xf0] }
  0x52   :  { %1322 = vmatmul.bf16.vlgmr.msrb.gmra.mxu0 %v2774_v35  ;;  %1336 = vmatmul.bf16.vlgmr.msrb.gmra.mxu1 %v2776_v39  ;;  %v2528_v9 = vld [vmem:[#allocation5 + $0x364] sm:$0xf]  ;;  %v2210_v13 = vld [vmem:[#allocation5 + $0x470] sm:$0xf0]  ;;  %v1957_v16 = vor.u32 %v2496_v7, %v1954_v8  ;;  %v2152_v2 = vld [vmem:[#allocation5 + $0x3e8] sm:$0xf]  ;;  %v2025_v8 = vor.u32 %v2515_v63, %v2024_v62 }
  0x53   :  { %1370 = vmatpush.bf16.msra.mxu0 %v2021_v26  ;;  %1384 = vmatpush.bf16.msra.mxu1 %v2149_v29  ;;  %v2560_v12 = vld [vmem:[#allocation5 + $0x464] sm:$0xf]  ;;  %v2338_v15 = vld [vmem:[#allocation5 + $0x570] sm:$0xf0]  ;;  %v2085_v17 = vor.u32 %v2528_v9, %v2082_v11  ;;  %v1752_v9 = vld [vmem:[#allocation5 + $0xc8] sm:$0xf] }
  0x54   :  { %1398 = vmatpush.bf16.msra.mxu2 %v2277_v30  ;;  %1364 = vmatmul.bf16.vlgmr.msrb.gmra.mxu3 %v2765_v6  ;;  %v2592_v14 = vld [vmem:[#allocation5 + $0x564] sm:$0xf]  ;;  %v2213_v18 = vor.u32 %v2560_v12, %v2210_v13  ;;  %v1938_v20 = vld [vmem:[#allocation5 + $0x250] sm:$0xf0]  ;;  %v1880_v11 = vld [vmem:[#allocation5 + $0x1c8] sm:$0xf] }
  0x55   :  { %1412 = vmatpush.bf16.msra.mxu3 %v2405_v34  ;;  %1350 = vmatmul.bf16.vlgmr.msrb.gmra.mxu2 %v2762_v57  ;;  %v2492_v19 = vld [vmem:[#allocation5 + $0x244] sm:$0xf]  ;;  %v2341_v24 = vor.u32 %v2592_v14, %v2338_v15  ;;  %v2066_v25 = vld [vmem:[#allocation5 + $0x350] sm:$0xf0]  ;;  %v2479_v13 = vld [vmem:[#allocation5 + $0x1d4] sm:$0xf0] }
  0x56   :  { %v2524_v21 = vld [vmem:[#allocation5 + $0x344] sm:$0xf]  ;;  %v2194_v27 = vld [vmem:[#allocation5 + $0x450] sm:$0xf0]  ;;  %v1941_v30 = vor.u32 %v2492_v19, %v1938_v20  ;;  %v2008_v14 = vld [vmem:[#allocation5 + $0x2c8] sm:$0xf]  ;;  %v1881_v19 = vor.u32 %v2479_v13, %v1880_v11 }
  0x57   :  { %1371 = vmatpush.bf16.msra.mxu0 %v2005_v42  ;;  %1385 = vmatpush.bf16.msra.mxu1 %v2133_v43  ;;  %v2556_v26 = vld [vmem:[#allocation5 + $0x444] sm:$0xf]  ;;  %v2322_v29 = vld [vmem:[#allocation5 + $0x550] sm:$0xf0]  ;;  %v2069_v31 = vor.u32 %v2524_v21, %v2066_v25  ;;  %v2511_v15 = vld [vmem:[#allocation5 + $0x2d4] sm:$0xf0] }
  0x58   :  { %1399 = vmatpush.bf16.msra.mxu2 %v2261_v44  ;;  %v2588_v28 = vld [vmem:[#allocation5 + $0x544] sm:$0xf]  ;;  %v2197_v32 = vor.u32 %v2556_v26, %v2194_v27  ;;  %v1922_v34 = vld [vmem:[#allocation5 + $0x230] sm:$0xf0]  ;;  %v2009_v20 = vor.u32 %v2511_v15, %v2008_v14  ;;  %v1736_v21 = vld [vmem:[#allocation5 + $0xa8] sm:$0xf] }
  0x59   :  { %1413 = vmatpush.bf16.msra.mxu3 %v2389_v48  ;;  %v2488_v33 = vld [vmem:[#allocation5 + $0x224] sm:$0xf]  ;;  %v2325_v37 = vor.u32 %v2588_v28, %v2322_v29  ;;  %v2050_v38 = vld [vmem:[#allocation5 + $0x330] sm:$0xf0]  ;;  %v1864_v25 = vld [vmem:[#allocation5 + $0x1a8] sm:$0xf] }
  0x5a   :  { %v2520_v36 = vld [vmem:[#allocation5 + $0x324] sm:$0xf]  ;;  %v2178_v41 = vld [vmem:[#allocation5 + $0x430] sm:$0xf0]  ;;  %v1925_v44 = vor.u32 %v2488_v33, %v1922_v34  ;;  %v2475_v27 = vld [vmem:[#allocation5 + $0x1b4] sm:$0xf0] }
  0x5b   :  { %1372 = vmatpush.bf16.msra.mxu0 %v1989_v54  ;;  %1386 = vmatpush.bf16.msra.mxu1 %v2117_v55  ;;  %v2552_v40 = vld [vmem:[#allocation5 + $0x424] sm:$0xf]  ;;  %v2306_v43 = vld [vmem:[#allocation5 + $0x530] sm:$0xf0]  ;;  %v2053_v47 = vor.u32 %v2520_v36, %v2050_v38  ;;  %v1992_v28 = vld [vmem:[#allocation5 + $0x2a8] sm:$0xf]  ;;  %v1865_v33 = vor.u32 %v2475_v27, %v1864_v25 }
  0x5c   :  { %1400 = vmatpush.bf16.msra.mxu2 %v2245_v56  ;;  %v2584_v42 = vld [vmem:[#allocation5 + $0x524] sm:$0xf]  ;;  %v1906_v46 = vld [vmem:[#allocation5 + $0x210] sm:$0xf0]  ;;  %v2181_v48 = vor.u32 %v2552_v40, %v2178_v41  ;;  %v1768_v56 = vld [vmem:[#allocation5 + $0xe8] sm:$0xf] }
  0x5d   :  { %1414 = vmatpush.bf16.msra.mxu3 %v2373_v61  ;;  %v2484_v45 = vld [vmem:[#allocation5 + $0x204] sm:$0xf]  ;;  %v2034_v50 = vld [vmem:[#allocation5 + $0x310] sm:$0xf0]  ;;  %v2309_v52 = vor.u32 %v2584_v42, %v2306_v43  ;;  %v2483_v61 = vld [vmem:[#allocation5 + $0x1f4] sm:$0xf0] }
  0x5e   :  { %v2516_v49 = vld [vmem:[#allocation5 + $0x304] sm:$0xf]  ;;  %v2162_v53 = vld [vmem:[#allocation5 + $0x410] sm:$0xf0]  ;;  %v1909_v60 = vor.u32 %v2484_v45, %v1906_v46  ;;  %v1897_v7 = vor.u32 %v2483_v61, %v1896_v59  ;;  %v2507_v29 = vld [vmem:[#allocation5 + $0x2b4] sm:$0xf0] }
  0x5f   :  { %1373 = vmatpush.bf16.msra.mxu0 %v1973_v3  ;;  %1387 = vmatpush.bf16.msra.mxu1 %v2101_v4  ;;  %v2548_v51 = vld [vmem:[#allocation5 + $0x404] sm:$0xf]  ;;  %v2290_v55 = vld [vmem:[#allocation5 + $0x510] sm:$0xf0]  ;;  %v2037_v0 = vor.u32 %v2516_v49, %v2034_v50  ;;  %v2547_v3 = vld [vmem:[#allocation5 + $0x3f4] sm:$0xf0]  ;;  %v1993_v34 = vor.u32 %v2507_v29, %v1992_v28 }
  0x60   :  { %1401 = vmatpush.bf16.msra.mxu2 %v2229_v5  ;;  %v2580_v54 = vld [vmem:[#allocation5 + $0x504] sm:$0xf]  ;;  %v2165_v1 = vor.u32 %v2548_v51, %v2162_v53  ;;  %v1769_v5 = vor.u32 %v2451_v58, %v1768_v56  ;;  %v2153_v12 = vor.u32 %v2547_v3, %v2152_v2  ;;  %v1720_v36 = vld [vmem:[#allocation5 + $0x88] sm:$0xf]  ;;  %v2471_v41 = vld [vmem:[#allocation5 + $0x194] sm:$0xf0] }
  0x61   :  { %1415 = vmatpush.bf16.msra.mxu3 %v2357_v10  ;;  %v2293_v4 = vor.u32 %v2580_v54, %v2290_v55  ;;  %v2447_v10 = vld [vmem:[#allocation5 + $0xd4] sm:$0xf0]  ;;  %v1848_v38 = vld [vmem:[#allocation5 + $0x188] sm:$0xf] }
  0x62   :  { %v1976_v42 = vld [vmem:[#allocation5 + $0x288] sm:$0xf]  ;;  %v2503_v43 = vld [vmem:[#allocation5 + $0x294] sm:$0xf0] }
  0x63   :  { %1374 = vmatpush.bf16.msra.mxu0 %v1957_v16  ;;  %1388 = vmatpush.bf16.msra.mxu1 %v2085_v17  ;;  %v2136_v16 = vld [vmem:[#allocation5 + $0x3c8] sm:$0xf]  ;;  %v2543_v17 = vld [vmem:[#allocation5 + $0x3d4] sm:$0xf0] }
  0x64   :  { %1402 = vmatpush.bf16.msra.mxu2 %v2213_v18  ;;  %v1753_v18 = vor.u32 %v2447_v10, %v1752_v9  ;;  %v2137_v26 = vor.u32 %v2543_v17, %v2136_v16  ;;  %v2535_v45 = vld [vmem:[#allocation5 + $0x394] sm:$0xf0]  ;;  %v1704_v49 = vld [vmem:[#allocation5 + $0x68] sm:$0xf] }
  0x65   :  { %1416 = vmatpush.bf16.msra.mxu3 %v2341_v24  ;;  %v2443_v24 = vld [vmem:[#allocation5 + $0xb4] sm:$0xf0]  ;;  %v1832_v51 = vld [vmem:[#allocation5 + $0x168] sm:$0xf] }
  0x66   :  { %v2435_v50 = vld [vmem:[#allocation5 + $0x74] sm:$0xf0]  ;;  %v1960_v54 = vld [vmem:[#allocation5 + $0x268] sm:$0xf] }
  0x67   :  { %1375 = vmatpush.bf16.msra.mxu0 %v1941_v30  ;;  %1389 = vmatpush.bf16.msra.mxu1 %v2069_v31  ;;  %v2120_v30 = vld [vmem:[#allocation5 + $0x3a8] sm:$0xf]  ;;  %v2539_v31 = vld [vmem:[#allocation5 + $0x3b4] sm:$0xf0]  ;;  %v1705_v59 = vor.u32 %v2435_v50, %v1704_v49 }
  0x68   :  { %1403 = vmatpush.bf16.msra.mxu2 %v2197_v32  ;;  %v1737_v32 = vor.u32 %v2443_v24, %v1736_v21  ;;  %v2121_v40 = vor.u32 %v2539_v31, %v2120_v30  ;;  %v2467_v53 = vld [vmem:[#allocation5 + $0x174] sm:$0xf0]  ;;  %v2088_v56 = vld [vmem:[#allocation5 + $0x368] sm:$0xf] }
  0x69   :  { %1417 = vmatpush.bf16.msra.mxu3 %v2325_v37  ;;  %v2439_v37 = vld [vmem:[#allocation5 + $0x94] sm:$0xf0]  ;;  %v1688_v62 = vld [vmem:[#allocation5 + $0x48] sm:$0xf] }
  0x6a   :  { %v1721_v46 = vor.u32 %v2439_v37, %v1720_v36  ;;  %v2499_v55 = vld [vmem:[#allocation5 + $0x274] sm:$0xf0]  ;;  %v1944_v3 = vld [vmem:[#allocation5 + $0x248] sm:$0xf] }
  0x6b   :  { %1376 = vmatpush.bf16.msra.mxu0 %v1925_v44  ;;  %1390 = vmatpush.bf16.msra.mxu1 %v2053_v47  ;;  %v2104_v44 = vld [vmem:[#allocation5 + $0x388] sm:$0xf]  ;;  %v1849_v47 = vor.u32 %v2471_v41, %v1848_v38  ;;  %v2531_v58 = vld [vmem:[#allocation5 + $0x374] sm:$0xf0]  ;;  %v1961_v61 = vor.u32 %v2499_v55, %v1960_v54  ;;  %v2449_v41 = vld [vmem:[#allocation5 + $0xec] sm:$0xf] }
  0x6c   :  { %1404 = vmatpush.bf16.msra.mxu2 %v2181_v48  ;;  %v1977_v48 = vor.u32 %v2503_v43, %v1976_v42  ;;  %v2431_v63 = vld [vmem:[#allocation5 + $0x54] sm:$0xf0]  ;;  %v1672_v11 = vld [vmem:[#allocation5 + $0x28] sm:$0xf]  ;;  %v1770_v42 = vld [vmem:[#allocation5 + $0xf8] sm:$0xf0] }
  0x6d   :  { %1418 = vmatpush.bf16.msra.mxu3 %v2309_v52  ;;  %v2105_v52 = vor.u32 %v2535_v45, %v2104_v44  ;;  %v2463_v2 = vld [vmem:[#allocation5 + $0x154] sm:$0xf0]  ;;  %v1800_v13 = vld [vmem:[#allocation5 + $0x128] sm:$0xf]  ;;  %v2481_v45 = vld [vmem:[#allocation5 + $0x1ec] sm:$0xf]  ;;  %v1773_v50 = vor.u32 %v2449_v41, %v1770_v42 }
  0x6e   :  { %v2459_v15 = vld [vmem:[#allocation5 + $0x134] sm:$0xf0]  ;;  %v1928_v16 = vld [vmem:[#allocation5 + $0x228] sm:$0xf] }
  0x6f   :  { %1377 = vmatpush.bf16.msra.mxu0 %v1909_v60  ;;  %1391 = vmatpush.bf16.msra.mxu1 %v2037_v0  ;;  %v1833_v60 = vor.u32 %v2467_v53, %v1832_v51  ;;  %v1816_v0 = vld [vmem:[#allocation5 + $0x148] sm:$0xf]  ;;  %v2491_v17 = vld [vmem:[#allocation5 + $0x234] sm:$0xf0]  ;;  %v1801_v25 = vor.u32 %v2459_v15, %v1800_v13 }
  0x70   :  { %1405 = vmatpush.bf16.msra.mxu2 %v2165_v1  ;;  %v2089_v1 = vor.u32 %v2531_v58, %v2088_v56  ;;  %v1817_v9 = vor.u32 %v2463_v2, %v1816_v0  ;;  %v1656_v21 = vld [vmem:[#allocation5 + $0x8] sm:$0xf]  ;;  %v2423_v24 = vld [vmem:[#allocation5 + $0x14] sm:$0xf0]  ;;  %v2445_v56 = vld [vmem:[#allocation5 + $0xcc] sm:$0xf] }
  0x71   :  { %1419 = vmatpush.bf16.msra.mxu3 %v2293_v4  ;;  %v2495_v4 = vld [vmem:[#allocation5 + $0x254] sm:$0xf0]  ;;  %v1784_v27 = vld [vmem:[#allocation5 + $0x108] sm:$0xf]  ;;  %v1657_v38 = vor.u32 %v2423_v24, %v1656_v21  ;;  %v1754_v58 = vld [vmem:[#allocation5 + $0xd8] sm:$0xf0] }
  0x72   :  { %1378 = vmatmul.bf16.vlgmr.msra.gmra.mxu0 %v2768_v22  ;;  %1392 = vmatmul.bf16.vlgmr.msra.gmra.mxu1 %v2770_v23  ;;  %v1945_v10 = vor.u32 %v2495_v4, %v1944_v3  ;;  %v2455_v28 = vld [vmem:[#allocation5 + $0x114] sm:$0xf0]  ;;  %v1912_v29 = vld [vmem:[#allocation5 + $0x208] sm:$0xf]  ;;  %v1850_v21 = vld [vmem:[#allocation5 + $0x198] sm:$0xf0] }
  0x73   :  { %1426 = vmatpush.bf16.msrb.mxu0 %v1769_v5  ;;  %1440 = vmatpush.bf16.msrb.mxu1 %v1897_v7  ;;  %v2072_v5 = vld [vmem:[#allocation5 + $0x348] sm:$0xf]  ;;  %v2527_v7 = vld [vmem:[#allocation5 + $0x354] sm:$0xf0]  ;;  %v1785_v43 = vor.u32 %v2455_v28, %v1784_v27 }
  0x74   :  { %1454 = vmatpush.bf16.msrb.mxu2 %v2025_v8  ;;  %1420 = vmatmul.bf16.vlgmr.msra.gmra.mxu3 %v2776_v39  ;;  %v1689_v8 = vor.u32 %v2431_v63, %v1688_v62  ;;  %v2073_v14 = vor.u32 %v2527_v7, %v2072_v5  ;;  %v2487_v31 = vld [vmem:[#allocation5 + $0x214] sm:$0xf0]  ;;  %v2408_v37 = vld [vmem:[#allocation5 + $0x5e8] sm:$0xf]  ;;  %v1757_v63 = vor.u32 %v2445_v56, %v1754_v58  ;;  %v2441_v5 = vld [vmem:[#allocation5 + $0xac] sm:$0xf] }
  0x75   :  { %1468 = vmatpush.bf16.msrb.mxu3 %v2153_v12  ;;  %1406 = vmatmul.bf16.vlgmr.msra.gmra.mxu2 %v2774_v35  ;;  %v2427_v12 = vld [vmem:[#allocation5 + $0x34] sm:$0xf0]  ;;  %v1913_v44 = vor.u32 %v2487_v31, %v1912_v29  ;;  %v2264_v51 = vld [vmem:[#allocation5 + $0x4c8] sm:$0xf]  ;;  %v1738_v7 = vld [vmem:[#allocation5 + $0xb8] sm:$0xf0] }
  0x76   :  { %v2579_v36 = vld [vmem:[#allocation5 + $0x4f4] sm:$0xf0]  ;;  %v2392_v53 = vld [vmem:[#allocation5 + $0x5c8] sm:$0xf] }
  0x77   :  { %1427 = vmatpush.bf16.msrb.mxu0 %v1753_v18  ;;  %1441 = vmatpush.bf16.msrb.mxu1 %v1881_v19  ;;  %v2056_v18 = vld [vmem:[#allocation5 + $0x328] sm:$0xf]  ;;  %v2523_v19 = vld [vmem:[#allocation5 + $0x334] sm:$0xf0] }
  0x78   :  { %1455 = vmatpush.bf16.msrb.mxu2 %v2009_v20  ;;  %v1673_v20 = vor.u32 %v2427_v12, %v1672_v11  ;;  %v2057_v30 = vor.u32 %v2523_v19, %v2056_v18  ;;  %v2607_v55 = vld [vmem:[#allocation5 + $0x5d4] sm:$0xf0]  ;;  %v2248_v0 = vld [vmem:[#allocation5 + $0x4a8] sm:$0xf]  ;;  %v1741_v12 = vor.u32 %v2441_v5, %v1738_v7  ;;  %v2437_v18 = vld [vmem:[#allocation5 + $0x8c] sm:$0xf] }
  0x79   :  { %1469 = vmatpush.bf16.msrb.mxu3 %v2137_v26  ;;  %v1929_v26 = vor.u32 %v2491_v17, %v1928_v16  ;;  %v2393_v62 = vor.u32 %v2607_v55, %v2392_v53  ;;  %v2376_v2 = vld [vmem:[#allocation5 + $0x5a8] sm:$0xf]  ;;  %v2603_v4 = vld [vmem:[#allocation5 + $0x5b4] sm:$0xf0]  ;;  %v1722_v19 = vld [vmem:[#allocation5 + $0x98] sm:$0xf0] }
  0x7a   :  { %v2377_v11 = vor.u32 %v2603_v4, %v2376_v2  ;;  %v2232_v13 = vld [vmem:[#allocation5 + $0x488] sm:$0xf]  ;;  %v2599_v17 = vld [vmem:[#allocation5 + $0x594] sm:$0xf0]  ;;  %v2421_v7 = vld [vmem:[#allocation5 + $0xc] sm:$0xf] }
  0x7b   :  { %1428 = vmatpush.bf16.msrb.mxu0 %v1737_v32  ;;  %1442 = vmatpush.bf16.msrb.mxu1 %v1865_v33  ;;  %v2040_v32 = vld [vmem:[#allocation5 + $0x308] sm:$0xf]  ;;  %v2519_v33 = vld [vmem:[#allocation5 + $0x314] sm:$0xf0] }
  0x7c   :  { %1456 = vmatpush.bf16.msrb.mxu2 %v1993_v34  ;;  %v2280_v34 = vld [vmem:[#allocation5 + $0x4e8] sm:$0xf]  ;;  %v2563_v28 = vld [vmem:[#allocation5 + $0x474] sm:$0xf0] }
  0x7d   :  { %1470 = vmatpush.bf16.msrb.mxu3 %v2121_v40  ;;  %v2611_v40 = vld [vmem:[#allocation5 + $0x5f4] sm:$0xf0]  ;;  %v2360_v15 = vld [vmem:[#allocation5 + $0x588] sm:$0xf] }
  0x7e   :  { %v2409_v49 = vor.u32 %v2611_v40, %v2408_v37  ;;  %v2216_v27 = vld [vmem:[#allocation5 + $0x468] sm:$0xf]  ;;  %v2595_v31 = vld [vmem:[#allocation5 + $0x574] sm:$0xf0] }
  0x7f   :  { %1429 = vmatpush.bf16.msrb.mxu0 %v1721_v46  ;;  %1443 = vmatpush.bf16.msrb.mxu1 %v1849_v47  ;;  %v1898_v46 = vld [vmem:[#allocation5 + $0x1f8] sm:$0xf0]  ;;  %v2041_v47 = vor.u32 %v2519_v33, %v2040_v32  ;;  %v2344_v29 = vld [vmem:[#allocation5 + $0x568] sm:$0xf]  ;;  %v2433_v32 = vld [vmem:[#allocation5 + $0x6c] sm:$0xf]  ;;  %v2217_v37 = vor.u32 %v2563_v28, %v2216_v27 }
  0x80   :  { %1457 = vmatpush.bf16.msrb.mxu2 %v1977_v48  ;;  %v2281_v48 = vor.u32 %v2579_v36, %v2280_v34  ;;  %v1901_v54 = vor.u32 %v2481_v45, %v1898_v46  ;;  %v1706_v33 = vld [vmem:[#allocation5 + $0x78] sm:$0xf0]  ;;  %v2465_v34 = vld [vmem:[#allocation5 + $0x16c] sm:$0xf]  ;;  %v2200_v41 = vld [vmem:[#allocation5 + $0x448] sm:$0xf] }
  0x81   :  { %1471 = vmatpush.bf16.msrb.mxu3 %v2105_v52  ;;  %v2575_v52 = vld [vmem:[#allocation5 + $0x4d4] sm:$0xf0]  ;;  %v1834_v36 = vld [vmem:[#allocation5 + $0x178] sm:$0xf0]  ;;  %v1709_v40 = vor.u32 %v2433_v32, %v1706_v33  ;;  %v2429_v46 = vld [vmem:[#allocation5 + $0x4c] sm:$0xf] }
  0x82   :  { %v2559_v42 = vld [vmem:[#allocation5 + $0x454] sm:$0xf0]  ;;  %v2184_v53 = vld [vmem:[#allocation5 + $0x428] sm:$0xf]  ;;  %v2138_v33 = vld [vmem:[#allocation5 + $0x3d8] sm:$0xf0] }
  0x83   :  { %1430 = vmatpush.bf16.msrb.mxu0 %v1705_v59  ;;  %1444 = vmatpush.bf16.msrb.mxu1 %v1833_v60  ;;  %v2477_v59 = vld [vmem:[#allocation5 + $0x1cc] sm:$0xf]  ;;  %v1882_v60 = vld [vmem:[#allocation5 + $0x1d8] sm:$0xf0]  ;;  %v2591_v45 = vld [vmem:[#allocation5 + $0x554] sm:$0xf0] }
  0x84   :  { %1458 = vmatpush.bf16.msrb.mxu2 %v1961_v61  ;;  %v2265_v61 = vor.u32 %v2575_v52, %v2264_v51  ;;  %v1885_v3 = vor.u32 %v2477_v59, %v1882_v60  ;;  %v2312_v55 = vld [vmem:[#allocation5 + $0x528] sm:$0xf]  ;;  %v2587_v58 = vld [vmem:[#allocation5 + $0x534] sm:$0xf0]  ;;  %v2425_v59 = vld [vmem:[#allocation5 + $0x2c] sm:$0xf] }
  0x85   :  { %1472 = vmatpush.bf16.msrb.mxu3 %v2089_v1  ;;  %v2571_v1 = vld [vmem:[#allocation5 + $0x4b4] sm:$0xf0]  ;;  %v1674_v60 = vld [vmem:[#allocation5 + $0x38] sm:$0xf0]  ;;  %v2313_v2 = vor.u32 %v2587_v58, %v2312_v55  ;;  %v2296_v4 = vld [vmem:[#allocation5 + $0x508] sm:$0xf] }
  0x86   :  { %v2583_v5 = vld [vmem:[#allocation5 + $0x514] sm:$0xf0]  ;;  %v2501_v55 = vld [vmem:[#allocation5 + $0x28c] sm:$0xf] }
  0x87   :  { %1431 = vmatpush.bf16.msrb.mxu0 %v1689_v8  ;;  %1445 = vmatpush.bf16.msrb.mxu1 %v1817_v9  ;;  %v2473_v8 = vld [vmem:[#allocation5 + $0x1ac] sm:$0xf]  ;;  %v1866_v9 = vld [vmem:[#allocation5 + $0x1b8] sm:$0xf0] }
  0x88   :  { %1459 = vmatpush.bf16.msrb.mxu2 %v1945_v10  ;;  %v2249_v10 = vor.u32 %v2571_v1, %v2248_v0  ;;  %v1869_v16 = vor.u32 %v2473_v8, %v1866_v9  ;;  %v2168_v0 = vld [vmem:[#allocation5 + $0x408] sm:$0xf]  ;;  %v2551_v1 = vld [vmem:[#allocation5 + $0x414] sm:$0xf0]  ;;  %v1658_v9 = vld [vmem:[#allocation5 + $0x18] sm:$0xf0] }
  0x89   :  { %1473 = vmatpush.bf16.msrb.mxu3 %v2073_v14  ;;  %v2567_v14 = vld [vmem:[#allocation5 + $0x494] sm:$0xf0]  ;;  %v2533_v58 = vld [vmem:[#allocation5 + $0x38c] sm:$0xf] }
  0x8a   :  { %v2233_v24 = vor.u32 %v2567_v14, %v2232_v13  ;;  %v2026_v13 = vld [vmem:[#allocation5 + $0x2f8] sm:$0xf0]  ;;  %v2545_v14 = vld [vmem:[#allocation5 + $0x3ec] sm:$0xf] }
  0x8b   :  { %1432 = vmatpush.bf16.msrb.mxu0 %v1673_v20  ;;  %1446 = vmatpush.bf16.msrb.mxu1 %v1801_v25  ;;  %v2469_v20 = vld [vmem:[#allocation5 + $0x18c] sm:$0xf]  ;;  %v2361_v25 = vor.u32 %v2599_v17, %v2360_v15  ;;  %v2169_v15 = vor.u32 %v2551_v1, %v2168_v0 }
  0x8c   :  { %1460 = vmatpush.bf16.msrb.mxu2 %v1929_v26  ;;  %v1725_v26 = vor.u32 %v2437_v18, %v1722_v19  ;;  %v2577_v17 = vld [vmem:[#allocation5 + $0x4ec] sm:$0xf]  ;;  %v2282_v18 = vld [vmem:[#allocation5 + $0x4f8] sm:$0xf0]  ;;  %v2297_v19 = vor.u32 %v2583_v5, %v2296_v4 }
  0x8d   :  { %1474 = vmatpush.bf16.msrb.mxu3 %v2057_v30  ;;  %v1853_v30 = vor.u32 %v2469_v20, %v1850_v21  ;;  %v1661_v20 = vor.u32 %v2421_v7, %v1658_v9  ;;  %v2609_v21 = vld [vmem:[#allocation5 + $0x5ec] sm:$0xf]  ;;  %v2285_v28 = vor.u32 %v2577_v17, %v2282_v18  ;;  %v2090_v7 = vld [vmem:[#allocation5 + $0x378] sm:$0xf0] }
  0x8e   :  { %v2529_v4 = vld [vmem:[#allocation5 + $0x36c] sm:$0xf]  ;;  %v2218_v9 = vld [vmem:[#allocation5 + $0x478] sm:$0xf0] }
  0x8f   :  { %1433 = vmatpush.bf16.msrb.mxu0 %v1657_v38  ;;  %1447 = vmatpush.bf16.msrb.mxu1 %v1785_v43  ;;  %v2345_v38 = vor.u32 %v2595_v31, %v2344_v29  ;;  %v2328_v43 = vld [vmem:[#allocation5 + $0x548] sm:$0xf]  ;;  %v2509_v29 = vld [vmem:[#allocation5 + $0x2cc] sm:$0xf] }
  0x90   :  { %1461 = vmatpush.bf16.msrb.mxu2 %v1913_v44  ;;  %v1837_v44 = vor.u32 %v2465_v34, %v1834_v36  ;;  %v2329_v51 = vor.u32 %v2591_v45, %v2328_v43  ;;  %v2541_v31 = vld [vmem:[#allocation5 + $0x3cc] sm:$0xf]  ;;  %v2266_v36 = vld [vmem:[#allocation5 + $0x4d8] sm:$0xf0] }
  0x91   :  { %1475 = vmatpush.bf16.msrb.mxu3 %v2041_v47  ;;  %v1690_v47 = vld [vmem:[#allocation5 + $0x58] sm:$0xf0]  ;;  %v2573_v34 = vld [vmem:[#allocation5 + $0x4cc] sm:$0xf] }
  0x92   :  { %1434 = vmatmul.bf16.vlgmr.msrb.gmra.mxu0 %v2762_v57  ;;  %1448 = vmatmul.bf16.vlgmr.msrb.gmra.mxu1 %v2765_v6  ;;  %v1693_v52 = vor.u32 %v2429_v46, %v1690_v47  ;;  %v2505_v43 = vld [vmem:[#allocation5 + $0x2ac] sm:$0xf]  ;;  %v2122_v47 = vld [vmem:[#allocation5 + $0x3b8] sm:$0xf0] }
  0x93   :  { %1482 = vmatpush.bf16.msra.mxu0 %v2281_v48  ;;  %1496 = vmatpush.bf16.msra.mxu1 %v2409_v49  ;;  %v2461_v48 = vld [vmem:[#allocation5 + $0x14c] sm:$0xf]  ;;  %v1818_v49 = vld [vmem:[#allocation5 + $0x158] sm:$0xf0] }
  0x94   :  { %1510 = vmatpush.bf16.msra.mxu2 %v1773_v50  ;;  %1476 = vmatmul.bf16.vlgmr.msrb.gmra.mxu3 %v2770_v23  ;;  %v2201_v50 = vor.u32 %v2559_v42, %v2200_v41  ;;  %v1821_v56 = vor.u32 %v2461_v48, %v1818_v49  ;;  %v2141_v41 = vor.u32 %v2541_v31, %v2138_v33  ;;  %v2537_v45 = vld [vmem:[#allocation5 + $0x3ac] sm:$0xf]  ;;  %v2250_v49 = vld [vmem:[#allocation5 + $0x4b8] sm:$0xf0] }
  0x95   :  { %1524 = vmatpush.bf16.msra.mxu3 %v1901_v54  ;;  %1462 = vmatmul.bf16.vlgmr.msrb.gmra.mxu2 %v2768_v22  ;;  %v2555_v54 = vld [vmem:[#allocation5 + $0x434] sm:$0xf0]  ;;  %v2269_v42 = vor.u32 %v2573_v34, %v2266_v36  ;;  %v2569_v48 = vld [vmem:[#allocation5 + $0x4ac] sm:$0xf]  ;;  %v2058_v33 = vld [vmem:[#allocation5 + $0x338] sm:$0xf0] }
  0x96   :  { %v2525_v17 = vld [vmem:[#allocation5 + $0x34c] sm:$0xf]  ;;  %v2186_v36 = vld [vmem:[#allocation5 + $0x438] sm:$0xf0] }
  0x97   :  { %1483 = vmatpush.bf16.msra.mxu0 %v2265_v61  ;;  %1497 = vmatpush.bf16.msra.mxu1 %v2393_v62  ;;  %v2457_v61 = vld [vmem:[#allocation5 + $0x12c] sm:$0xf]  ;;  %v1802_v62 = vld [vmem:[#allocation5 + $0x138] sm:$0xf0] }
  0x98   :  { %1511 = vmatpush.bf16.msra.mxu2 %v1757_v63  ;;  %v2185_v63 = vor.u32 %v2555_v54, %v2184_v53  ;;  %v1805_v8 = vor.u32 %v2457_v61, %v1802_v62  ;;  %v2125_v53 = vor.u32 %v2537_v45, %v2122_v47  ;;  %v2253_v54 = vor.u32 %v2569_v48, %v2250_v49  ;;  %v2565_v61 = vld [vmem:[#allocation5 + $0x48c] sm:$0xf]  ;;  %v2234_v62 = vld [vmem:[#allocation5 + $0x498] sm:$0xf0] }
  0x99   :  { %1525 = vmatpush.bf16.msra.mxu3 %v1885_v3  ;;  %v1677_v3 = vor.u32 %v2425_v59, %v1674_v60  ;;  %v2106_v60 = vld [vmem:[#allocation5 + $0x398] sm:$0xf0]  ;;  %v2521_v31 = vld [vmem:[#allocation5 + $0x32c] sm:$0xf] }
  0x9a   :  { %v2109_v1 = vor.u32 %v2533_v58, %v2106_v60  ;;  %v2553_v34 = vld [vmem:[#allocation5 + $0x42c] sm:$0xf]  ;;  %v2042_v47 = vld [vmem:[#allocation5 + $0x318] sm:$0xf0] }
  0x9b   :  { %1484 = vmatpush.bf16.msra.mxu0 %v2249_v10  ;;  %1498 = vmatpush.bf16.msra.mxu1 %v2377_v11  ;;  %v2453_v10 = vld [vmem:[#allocation5 + $0x10c] sm:$0xf]  ;;  %v1786_v11 = vld [vmem:[#allocation5 + $0x118] sm:$0xf0] }
  0x9c   :  { %1512 = vmatpush.bf16.msra.mxu2 %v1741_v12  ;;  %v2513_v12 = vld [vmem:[#allocation5 + $0x2ec] sm:$0xf]  ;;  %v2170_v49 = vld [vmem:[#allocation5 + $0x418] sm:$0xf0] }
  0x9d   :  { %1526 = vmatpush.bf16.msra.mxu3 %v1869_v16  ;;  %v2154_v16 = vld [vmem:[#allocation5 + $0x3f8] sm:$0xf0]  ;;  %v2517_v45 = vld [vmem:[#allocation5 + $0x30c] sm:$0xf] }
  0x9e   :  { %v2157_v27 = vor.u32 %v2545_v14, %v2154_v16  ;;  %v1946_v16 = vld [vmem:[#allocation5 + $0x258] sm:$0xf0]  ;;  %v2549_v48 = vld [vmem:[#allocation5 + $0x40c] sm:$0xf] }
  0x9f   :  { %1485 = vmatpush.bf16.msra.mxu0 %v2233_v24  ;;  %1499 = vmatpush.bf16.msra.mxu1 %v2361_v25  ;;  %v2410_v24 = vld [vmem:[#allocation5 + $0x5f8] sm:$0xf0]  ;;  %v1789_v25 = vor.u32 %v2453_v10, %v1786_v11  ;;  %v2593_v10 = vld [vmem:[#allocation5 + $0x56c] sm:$0xf] }
  0xa0   :  { %1513 = vmatpush.bf16.msra.mxu2 %v1725_v26  ;;  %v2029_v26 = vor.u32 %v2513_v12, %v2026_v13  ;;  %v2413_v32 = vor.u32 %v2609_v21, %v2410_v24  ;;  %v2346_v11 = vld [vmem:[#allocation5 + $0x578] sm:$0xf0]  ;;  %v2093_v13 = vor.u32 %v2529_v4, %v2090_v7  ;;  %v2589_v24 = vld [vmem:[#allocation5 + $0x54c] sm:$0xf] }
  0xa1   :  { %1527 = vmatpush.bf16.msra.mxu3 %v1853_v30  ;;  %v2010_v30 = vld [vmem:[#allocation5 + $0x2d8] sm:$0xf0]  ;;  %v2349_v18 = vor.u32 %v2593_v10, %v2346_v11 }
  0xa2   :  { %v2202_v21 = vld [vmem:[#allocation5 + $0x458] sm:$0xf0] }
  0xa3   :  { %1486 = vmatpush.bf16.msra.mxu0 %v2217_v37  ;;  %1500 = vmatpush.bf16.msra.mxu1 %v2345_v38  ;;  %v2605_v37 = vld [vmem:[#allocation5 + $0x5cc] sm:$0xf]  ;;  %v2394_v38 = vld [vmem:[#allocation5 + $0x5d8] sm:$0xf0] }
  0xa4   :  { %1514 = vmatpush.bf16.msra.mxu2 %v1709_v40  ;;  %v2013_v40 = vor.u32 %v2509_v29, %v2010_v30  ;;  %v2397_v46 = vor.u32 %v2605_v37, %v2394_v38  ;;  %v2489_v29 = vld [vmem:[#allocation5 + $0x22c] sm:$0xf]  ;;  %v1930_v30 = vld [vmem:[#allocation5 + $0x238] sm:$0xf0] }
  0xa5   :  { %1528 = vmatpush.bf16.msra.mxu3 %v1837_v44  ;;  %v1994_v44 = vld [vmem:[#allocation5 + $0x2b8] sm:$0xf0]  ;;  %v2585_v37 = vld [vmem:[#allocation5 + $0x52c] sm:$0xf] }
  0xa6   :  { %v2314_v38 = vld [vmem:[#allocation5 + $0x538] sm:$0xf0] }
  0xa7   :  { %1487 = vmatpush.bf16.msra.mxu0 %v2201_v50  ;;  %1501 = vmatpush.bf16.msra.mxu1 %v2329_v51  ;;  %v2601_v50 = vld [vmem:[#allocation5 + $0x5ac] sm:$0xf]  ;;  %v2378_v51 = vld [vmem:[#allocation5 + $0x5b8] sm:$0xf0] }
  0xa8   :  { %1515 = vmatpush.bf16.msra.mxu2 %v1693_v52  ;;  %v1997_v52 = vor.u32 %v2505_v43, %v1994_v44  ;;  %v2381_v59 = vor.u32 %v2601_v50, %v2378_v51  ;;  %v2485_v43 = vld [vmem:[#allocation5 + $0x20c] sm:$0xf]  ;;  %v1914_v44 = vld [vmem:[#allocation5 + $0x218] sm:$0xf0] }
  0xa9   :  { %1529 = vmatpush.bf16.msra.mxu3 %v1821_v56  ;;  %v1978_v56 = vld [vmem:[#allocation5 + $0x298] sm:$0xf0]  ;;  %v2581_v50 = vld [vmem:[#allocation5 + $0x50c] sm:$0xf] }
  0xaa   :  { %v1981_v0 = vor.u32 %v2501_v55, %v1978_v56  ;;  %v2298_v51 = vld [vmem:[#allocation5 + $0x518] sm:$0xf0] }
  0xab   :  { %1488 = vmatpush.bf16.msra.mxu0 %v2185_v63  ;;  %1502 = vmatpush.bf16.msra.mxu1 %v2313_v2  ;;  %v2597_v63 = vld [vmem:[#allocation5 + $0x58c] sm:$0xf]  ;;  %v2301_v55 = vor.u32 %v2581_v50, %v2298_v51 }
  0xac   :  { %1516 = vmatpush.bf16.msra.mxu2 %v1677_v3  ;;  %v2497_v2 = vld [vmem:[#allocation5 + $0x26c] sm:$0xf]  ;;  %v1962_v3 = vld [vmem:[#allocation5 + $0x278] sm:$0xf0] }
  0xad   :  { %1530 = vmatpush.bf16.msra.mxu3 %v1805_v8  ;;  %v2561_v8 = vld [vmem:[#allocation5 + $0x46c] sm:$0xf]  ;;  %v1965_v12 = vor.u32 %v2497_v2, %v1962_v3 }
  0xae   :  { %v2221_v14 = vor.u32 %v2561_v8, %v2218_v9 }
  0xaf   :  { %1489 = vmatpush.bf16.msra.mxu0 %v2169_v15  ;;  %1503 = vmatpush.bf16.msra.mxu1 %v2297_v19  ;;  %v2493_v15 = vld [vmem:[#allocation5 + $0x24c] sm:$0xf]  ;;  %v2074_v19 = vld [vmem:[#allocation5 + $0x358] sm:$0xf0]  ;;  %v1281_v58 = vpop.f32.mrf.mxu1 }
  0xb0   :  { %1517 = vmatpush.bf16.msra.mxu2 %v1661_v20  ;;  %v2557_v20 = vld [vmem:[#allocation5 + $0x44c] sm:$0xf] }
  0xb1   :  { %1531 = vmatpush.bf16.msra.mxu3 %v1789_v25  ;;  %v2330_v25 = vld [vmem:[#allocation5 + $0x558] sm:$0xf0] }
  0xb2   :  { %1490 = vmatmul.bf16.vlgmr.msra.gmra.mxu0 %v2774_v35  ;;  %1504 = vmatmul.bf16.vlgmr.msra.gmra.mxu1 %v2776_v39 }
  0xb3   :  { %1538 = vmatpush.bf16.msrb.mxu0 %v2029_v26  ;;  %1552 = vmatpush.bf16.msrb.mxu1 %v2157_v27  ;;  %v1949_v26 = vor.u32 %v2493_v15, %v1946_v16  ;;  %v2077_v27 = vor.u32 %v2525_v17, %v2074_v19  ;;  %v1267_v56 = vpop.f32.mrf.mxu0 }
  0xb4   :  { %1566 = vmatpush.bf16.msrb.mxu2 %v2285_v28  ;;  %1532 = vmatmul.bf16.vlgmr.msra.gmra.mxu3 %v2765_v6  ;;  %v2237_v6 = vor.u32 %v2565_v61, %v2234_v62  ;;  %v2205_v28 = vor.u32 %v2557_v20, %v2202_v21 }
  0xb5   :  { %1580 = vmatpush.bf16.msrb.mxu3 %v2413_v32  ;;  %1518 = vmatmul.bf16.vlgmr.msra.gmra.mxu2 %v2762_v57  ;;  %v2362_v57 = vld [vmem:[#allocation5 + $0x598] sm:$0xf0]  ;;  %v2333_v32 = vor.u32 %v2589_v24, %v2330_v25 }
  0xb6   :  { %v2365_v5 = vor.u32 %v2597_v63, %v2362_v57 }
  0xb7   :  { %1539 = vmatpush.bf16.msrb.mxu0 %v2013_v40  ;;  %1553 = vmatpush.bf16.msrb.mxu1 %v2141_v41  ;;  %v1933_v40 = vor.u32 %v2489_v29, %v1930_v30  ;;  %v2061_v41 = vor.u32 %v2521_v31, %v2058_v33  ;;  %v1309_v60 = vpop.f32.mrf.mxu3  ;;  %v1283_v62 = vpop.f32.mrf.mxu1 }
  0xb8   :  { %1567 = vmatpush.bf16.msrb.mxu2 %v2269_v42  ;;  %v2189_v42 = vor.u32 %v2553_v34, %v2186_v36 }
  0xb9   :  { %1581 = vmatpush.bf16.msrb.mxu3 %v2397_v46  ;;  %v2317_v46 = vor.u32 %v2585_v37, %v2314_v38 }
  0xbb   :  { %1540 = vmatpush.bf16.msrb.mxu0 %v1997_v52  ;;  %1554 = vmatpush.bf16.msrb.mxu1 %v2125_v53  ;;  %v1917_v52 = vor.u32 %v2485_v43, %v1914_v44  ;;  %v2045_v53 = vor.u32 %v2517_v45, %v2042_v47  ;;  %v1269_v61 = vpop.f32.mrf.mxu0 }
  0xbc   :  { %1568 = vmatpush.bf16.msrb.mxu2 %v2253_v54  ;;  %v2173_v54 = vor.u32 %v2549_v48, %v2170_v49 }
  0xbd   :  { %1582 = vmatpush.bf16.msrb.mxu3 %v2381_v59 }
  0xbf   :  { %1541 = vmatpush.bf16.msrb.mxu0 %v1981_v0  ;;  %1555 = vmatpush.bf16.msrb.mxu1 %v2109_v1  ;;  %v1311_v57 = vpop.f32.mrf.mxu3  ;;  %v2798_v1 = vld [vmem:[#allocation7] sm:$0xf] }
  0xc0   :  { %1569 = vmatpush.bf16.msrb.mxu2 %v2237_v6  ;;  %v1295_v59 = vpop.f32.mrf.mxu2  ;;  %v260_v2 = vperm.slane %v2798_v1, 0 }
  0xc1   :  { %1583 = vmatpush.bf16.msrb.mxu3 %v2365_v5 }
  0xc2   :  { %v1268_v4 = vadd.f32 %v1267_v56, %v260_v2  ;;  %v1270_v10 = vadd.f32 %v1269_v61, %v260_v2  ;;  %v263_v61 = vperm.slane %v2798_v1, 3 }
  0xc3   :  { %1542 = vmatpush.bf16.msrb.mxu0 %v1965_v12  ;;  %1556 = vmatpush.bf16.msrb.mxu1 %v2093_v13 }
  0xc4   :  { %1570 = vmatpush.bf16.msrb.mxu2 %v2221_v14  ;;  %v1282_v7 = vadd.f32 %v1281_v58, %v1268_v4  ;;  %v1284_v16 = vadd.f32 %v1283_v62, %v1270_v10 }
  0xc5   :  { %1584 = vmatpush.bf16.msrb.mxu3 %v2349_v18 }
  0xc6   :  { %v1296_v11 = vadd.f32 %v1295_v59, %v1282_v7 }
  0xc7   :  { %1543 = vmatpush.bf16.msrb.mxu0 %v1949_v26  ;;  %1557 = vmatpush.bf16.msrb.mxu1 %v2077_v27 }
  0xc8   :  { %1571 = vmatpush.bf16.msrb.mxu2 %v2205_v28  ;;  %v1297_v63 = vpop.f32.mrf.mxu2  ;;  %v1310_v17 = vadd.f32 %v1309_v60, %v1296_v11 }
  0xc9   :  { %1585 = vmatpush.bf16.msrb.mxu3 %v2333_v32  ;;  %v1298_v21 = vadd.f32 %v1297_v63, %v1284_v16 }
  0xcb   :  { %1544 = vmatpush.bf16.msrb.mxu0 %v1933_v40  ;;  %1558 = vmatpush.bf16.msrb.mxu1 %v2061_v41  ;;  %v1312_v30 = vadd.f32 %v1311_v57, %v1298_v21 }
  0xcc   :  { %1572 = vmatpush.bf16.msrb.mxu2 %v2189_v42 }
  0xcd   :  { %1586 = vmatpush.bf16.msrb.mxu3 %v2317_v46 }
  0xcf   :  { %1545 = vmatpush.bf16.msrb.mxu0 %v1917_v52  ;;  %1559 = vmatpush.bf16.msrb.mxu1 %v2045_v53  ;;  %v1323_v0 = vpop.f32.mrf.mxu0  ;;  %v1337_v6 = vpop.f32.mrf.mxu1 }
  0xd0   :  { %1573 = vmatpush.bf16.msrb.mxu2 %v2173_v54  ;;  %v1324_v20 = vadd.f32 %v1323_v0, %v1310_v17 }
  0xd1   :  { %1587 = vmatpush.bf16.msrb.mxu3 %v2301_v55  ;;  %v262_v55 = vperm.slane %v2798_v1, 2 }
  0xd2   :  { %1546 = vmatmul.bf16.vlgmr.msrb.gmra.mxu0 %v2768_v22  ;;  %1560 = vmatmul.bf16.vlgmr.msrb.gmra.mxu1 %v2770_v23  ;;  %v261_v23 = vperm.slane %v2798_v1, 1  ;;  %v1338_v29 = vadd.f32 %v1337_v6, %v1324_v20 }
  0xd3   :  { %1574 = vmatmul.bf16.vlgmr.msrb.gmra.mxu2 %v2774_v35 }
  0xd4   :  { %1588 = vmatmul.bf16.vlgmr.msrb.gmra.mxu3 %v2776_v39 }
  0xd7   :  { %v1365_v22 = vpop.f32.mrf.mxu3  ;;  %v1325_v35 = vpop.f32.mrf.mxu0 }
  0xd8   :  { %v1351_v3 = vpop.f32.mrf.mxu2  ;;  %v1339_v5 = vpop.f32.mrf.mxu1  ;;  %v1326_v36 = vadd.f32 %v1325_v35, %v1312_v30 }
  0xd9   :  { %v1352_v39 = vadd.f32 %v1351_v3, %v261_v23 }
  0xda   :  { %v1340_v42 = vadd.f32 %v1339_v5, %v1326_v36 }
  0xdb   :  { %v1366_v8 = vadd.f32 %v1365_v22, %v1352_v39 }
  0xdf   :  { %v1367_v12 = vpop.f32.mrf.mxu3 }
  0xe0   :  { %v1353_v9 = vpop.f32.mrf.mxu2 }
  0xe1   :  { %v1354_v18 = vadd.f32 %v1353_v9, %v261_v23 }
  0xe3   :  { %v1368_v24 = vadd.f32 %v1367_v12, %v1354_v18 }
  0xef   :  { %v1379_v13 = vpop.f32.mrf.mxu0  ;;  %v1393_v15 = vpop.f32.mrf.mxu1 }
  0xf0   :  { %v1380_v14 = vadd.f32 %v1379_v13, %v1366_v8 }
  0xf2   :  { %v1394_v19 = vadd.f32 %v1393_v15, %v1380_v14 }
  0xf7   :  { %v1381_v27 = vpop.f32.mrf.mxu0  ;;  %v1421_v28 = vpop.f32.mrf.mxu3 }
  0xf8   :  { %v1407_v25 = vpop.f32.mrf.mxu2  ;;  %v1382_v31 = vadd.f32 %v1381_v27, %v1368_v24  ;;  %v1395_v33 = vpop.f32.mrf.mxu1 }
  0xf9   :  { %v1408_v26 = vadd.f32 %v1407_v25, %v1394_v19 }
  0xfa   :  { %v1396_v37 = vadd.f32 %v1395_v33, %v1382_v31 }
  0xfb   :  { %v1422_v32 = vadd.f32 %v1421_v28, %v1408_v26 }
  0xfd   :  { %v1594_v34 = vpack.c.bf16 %v1422_v32, %v1338_v29 }
  0xff   :  { %1598 = vst [vmem:[#allocation8] sm:$0xff] %v1594_v34  ;;  %v1423_v41 = vpop.f32.mrf.mxu3 }
 0x100   :  { %v1409_v38 = vpop.f32.mrf.mxu2 }
 0x101   :  { %v1410_v40 = vadd.f32 %v1409_v38, %v1396_v37 }
 0x103   :  { %v1424_v43 = vadd.f32 %v1423_v41, %v1410_v40 }
 0x105   :  { %v1596_v44 = vpack.c.bf16 %v1424_v43, %v1340_v42 }
 0x107   :  { %1600 = vst [vmem:[#allocation8 + $0x10] sm:$0xff] %v1596_v44 }
 0x10f   :  { %v1435_v45 = vpop.f32.mrf.mxu0  ;;  %v1449_v46 = vpop.f32.mrf.mxu1 }
 0x110   :  { %v1436_v58 = vadd.f32 %v1435_v45, %v262_v55 }
 0x112   :  { %v1450_v62 = vadd.f32 %v1449_v46, %v1436_v58 }
 0x117   :  { %v1477_v48 = vpop.f32.mrf.mxu3  ;;  %v1437_v49 = vpop.f32.mrf.mxu0 }
 0x118   :  { %v1463_v47 = vpop.f32.mrf.mxu2  ;;  %v1451_v50 = vpop.f32.mrf.mxu1  ;;  %v1438_v0 = vadd.f32 %v1437_v49, %v262_v55 }
 0x119   :  { %v1464_v6 = vadd.f32 %v1463_v47, %v1450_v62 }
 0x11a   :  { %v1452_v4 = vadd.f32 %v1451_v50, %v1438_v0 }
 0x11b   :  { %v1478_v35 = vadd.f32 %v1477_v48, %v1464_v6 }
 0x11f   :  { %v1479_v52 = vpop.f32.mrf.mxu3 }
 0x120   :  { %v1465_v51 = vpop.f32.mrf.mxu2 }
 0x121   :  { %v1466_v9 = vadd.f32 %v1465_v51, %v1452_v4 }
 0x123   :  { %v1480_v16 = vadd.f32 %v1479_v52, %v1466_v9 }
 0x12f   :  { %v1491_v53 = vpop.f32.mrf.mxu0  ;;  %v1505_v54 = vpop.f32.mrf.mxu1 }
 0x130   :  { %v1492_v8 = vadd.f32 %v1491_v53, %v1478_v35 }
 0x132   :  { %v1506_v15 = vadd.f32 %v1505_v54, %v1492_v8 }
 0x137   :  { %v1533_v59 = vpop.f32.mrf.mxu3  ;;  %v1493_v60 = vpop.f32.mrf.mxu0 }
 0x138   :  { %v1519_v56 = vpop.f32.mrf.mxu2  ;;  %v1507_v63 = vpop.f32.mrf.mxu1  ;;  %v1494_v21 = vadd.f32 %v1493_v60, %v1480_v16 }
 0x139   :  { %v1520_v57 = vadd.f32 %v1519_v56, %v263_v61 }
 0x13a   :  { %v1508_v28 = vadd.f32 %v1507_v63, %v1494_v21 }
 0x13b   :  { %v1534_v3 = vadd.f32 %v1533_v59, %v1520_v57 }
 0x13f   :  { %v1535_v22 = vpop.f32.mrf.mxu3 }
 0x140   :  { %v1521_v2 = vpop.f32.mrf.mxu2 }
 0x141   :  { %v1522_v7 = vadd.f32 %v1521_v2, %v263_v61 }
 0x143   :  { %v1536_v12 = vadd.f32 %v1535_v22, %v1522_v7 }
 0x14f   :  { %v1547_v23 = vpop.f32.mrf.mxu0  ;;  %v1561_v39 = vpop.f32.mrf.mxu1 }
 0x150   :  { %v1548_v5 = vadd.f32 %v1547_v23, %v1534_v3 }
 0x152   :  { %v1562_v10 = vadd.f32 %v1561_v39, %v1548_v5 }
 0x156   :  { %v1575_v11 = vpop.f32.mrf.mxu2 }
 0x157   :  { %v1576_v1 = vadd.f32 %v1575_v11, %v1562_v10  ;;  %v1589_v13 = vpop.f32.mrf.mxu3  ;;  %v1549_v14 = vpop.f32.mrf.mxu0 }
 0x158   :  { %v1550_v18 = vadd.f32 %v1549_v14, %v1536_v12  ;;  %v1563_v20 = vpop.f32.mrf.mxu1 }
 0x159   :  { %v1590_v17 = vadd.f32 %v1589_v13, %v1576_v1 }
 0x15a   :  { %v1564_v24 = vadd.f32 %v1563_v20, %v1550_v18 }
 0x15b   :  { %v1595_v19 = vpack.c.bf16 %v1590_v17, %v1506_v15 }
 0x15d   :  { %1599 = vst [vmem:[#allocation8 + $0x8] sm:$0xff] %v1595_v19 }
 0x15e   :  { %v1577_v25 = vpop.f32.mrf.mxu2 }
 0x15f   :  { %v1578_v26 = vadd.f32 %v1577_v25, %v1564_v24  ;;  %v1591_v27 = vpop.f32.mrf.mxu3 }
 0x161   :  { %v1592_v29 = vadd.f32 %v1591_v27, %v1578_v26 }
 0x163   :  { %v1597_v30 = vpack.c.bf16 %v1592_v29, %v1508_v28 }
 0x165   :  { %1601 = vst [vmem:[#allocation8 + $0x18] sm:$0xff] %v1597_v30 }
 0x166   :  { %1614 = dma.vmem_to_hbm [thread:$0]  %s1607_s29, 512, %s1609_s5, [#allocation4], %s2723_s20, %s2723_s20, %s2724_s21  }
 0x167   :  { %2720 = dma.done.wait [#allocation4], 512  }
 0x168   :  { %2721 = vsyncadd [#allocation4], 4294966784 }
 0x169   :  { %1619 = vsyncpa [#allocation3], 1 }
 0x16a   :  { %1620 = vsyncpa [#allocation6], 1 }
 0x16b   :  { %1621 = vsyncpa [#allocation4], 1 }

</bundles_post_ra>
